<compile_context>
chip_gen: v6e
topology: v6e:2x2x1
jax: 0.10.0
libtpu: 0.0.40
codegen_flags: <defaults>
</compile_context>

<pallas_src>
import jax
import jax.numpy as jnp
from jax.experimental import pallas as pl
from jax.experimental.pallas import tpu as pltpu


# --------------------------------------------------------------------------- #
# Small helpers
# --------------------------------------------------------------------------- #
def _round_up(n, m):
    return ((n + m - 1) // m) * m


def _divisor_tile(n, candidates):
    """Largest candidate that divides n (n is always a multiple of 8 here)."""
    for t in candidates:
        if n % t == 0:
            return t
    return n


def _vmem_limit_bytes(S_pad, D_pad, TQ, chunk):
    """Size the VMEM limit from actual need + headroom (review item #4)."""
    bf2, f4 = 2, 4
    need = (
        3 * S_pad * D_pad * bf2              # resident q/k/v bf16 scratch
        + 2 * S_pad * D_pad * bf2            # x (bf16, projection), double-buffered
        + 2 * TQ * D_pad * f4                # x residual tile, double-buffered
        + 2 * TQ * D_pad * f4                # output tile, double-buffered
        + 2 * (3 * D_pad * D_pad + D_pad * D_pad) * bf2   # wqkv + wd (<=2 bufs)
        + 2 * (3 * D_pad + 3 * D_pad) * f4                # biases + LN params
        + 2 * TQ * S_pad * f4                # scores + exp working set
        + chunk * 3 * D_pad * f4             # chunked qkv f32 temp
        + (4 << 20)                          # headroom (spill / misc)
    )
    try:
        cap = int(pltpu.get_tpu_info().vmem_capacity_bytes)
    except Exception:
        cap = 64 << 20                       # conservative (v7x per-TC)
    return max(16 << 20, min(int(need), cap - (4 << 20)))


# --------------------------------------------------------------------------- #
# Kernel
# --------------------------------------------------------------------------- #
def _make_kernel(S_pad, S_true, D_pad, D_true, TQ, chunk):
    n_chunks = S_pad // chunk
    inv_d = 1.0 / float(D_true)

    def kernel(xp_ref, xr_ref, wqkv_ref, bqkv_ref, wd_ref, bd_ref,
               gamma_ref, beta_ref, o_ref, q_scr, k_scr, v_scr):
        qi = pl.program_id(1)

        # ---- fused QKV projection, once per batch element, chunked over S ----
        def project_chunk(c):
            r0 = pl.multiple_of(c * chunk, chunk)
            xb = xp_ref[pl.ds(r0, chunk), :]                       # (chunk, Dp) bf16
            qkv = jnp.dot(xb, wqkv_ref[...],
                          preferred_element_type=jnp.float32)      # (chunk, 3Dp) f32
            qkv = qkv + bqkv_ref[...]
            q_scr[pl.ds(r0, chunk), :] = qkv[:, :D_pad].astype(jnp.bfloat16)
            k_scr[pl.ds(r0, chunk), :] = qkv[:, D_pad:2 * D_pad].astype(jnp.bfloat16)
            v_scr[pl.ds(r0, chunk), :] = qkv[:, 2 * D_pad:].astype(jnp.bfloat16)

        @pl.when(qi == 0)
        def _():
            if n_chunks == 1:
                project_chunk(0)
            else:
                def body(c, carry):
                    project_chunk(c)
                    return carry
                jax.lax.fori_loop(0, n_chunks, body, 0, unroll=(n_chunks <= 4))

        # ---- attention for this query tile ----
        q_start = pl.multiple_of(qi * TQ, TQ)
        q_tile = q_scr[pl.ds(q_start, TQ), :]                       # (TQ, Dp) bf16

        # scores = q @ k^T, contracting last dims directly (no XLU transpose).
        scores = jax.lax.dot_general(
            q_tile, k_scr[...],
            dimension_numbers=(((1,), (1,)), ((), ())),
            preferred_element_type=jnp.float32)                     # (TQ, S_pad) f32
        # NOTE: no 1/sqrt(d_k) scaling and no mask -- matches the torch module.
        if S_pad != S_true:
            # Mask out the padded key rows (their k/v carry the bias, not zeros).
            key_idx = jax.lax.broadcasted_iota(jnp.int32, (TQ, S_pad), 1)
            scores = jnp.where(key_idx < S_true, scores, jnp.float32(-1e30))

        m = jnp.max(scores, axis=-1, keepdims=True)
        e = jnp.exp(scores - m)                                     # (TQ, S_pad) f32
        denom = jnp.sum(e, axis=-1, keepdims=True)                  # (TQ, 1)

        # Deferred softmax normalization: scale the (TQ, Dp) context, not (TQ, S).
        ctx = jnp.dot(e.astype(jnp.bfloat16), v_scr[...],
                      preferred_element_type=jnp.float32)           # (TQ, Dp)
        ctx = ctx * pl.reciprocal(denom, approx=True)               # EUP vrcp

        # dense + residual
        y = jnp.dot(ctx.astype(jnp.bfloat16), wd_ref[...],
                    preferred_element_type=jnp.float32)
        y = y + bd_ref[...] + xr_ref[...]

        # LayerNorm over the TRUE feature dim.  Padded columns of y are exactly
        # zero, so sum(y)/D_true and sum(y*y)/D_true give the unpadded moments.
        mu = jnp.sum(y, axis=-1, keepdims=True) * inv_d
        var = jnp.sum(y * y, axis=-1, keepdims=True) * inv_d - mu * mu
        y_hat = (y - mu) * jax.lax.rsqrt(var + 1e-5)
        o_ref[...] = (y_hat * gamma_ref[...] + beta_ref[...]).astype(o_ref.dtype)

    return kernel


# --------------------------------------------------------------------------- #
# pallas_call wrapper
# --------------------------------------------------------------------------- #
def _attention_call(x_proj, x_res, prep, *, S_pad, S_true, D_pad, D_true,
                    TQ, chunk, single_buffer_consts):
    B = x_proj.shape[0]
    n_q = S_pad // TQ
    kernel = _make_kernel(S_pad, S_true, D_pad, D_true, TQ, chunk)

    const_kwargs = {}
    if single_buffer_consts:
        # Constant index_map -> second buffer is pure VMEM waste (review item).
        const_kwargs["pipeline_mode"] = pl.Buffered(1)

    def const(shape):
        return pl.BlockSpec(shape, lambda b, q: (0, 0), **const_kwargs)

    in_specs = [
        # bf16 x, batch-resident, used only for the QKV projection.
        pl.BlockSpec((None, S_pad, D_pad), lambda b, q: (b, 0, 0)),
        # f32 x, small per-query-tile block, used only for the residual.
        pl.BlockSpec((None, TQ, D_pad), lambda b, q: (b, q, 0)),
        const((D_pad, 3 * D_pad)), const((1, 3 * D_pad)),        # fused qkv
        const((D_pad, D_pad)), const((1, D_pad)),                # dense
        const((1, D_pad)), const((1, D_pad)),                    # LN gamma, beta
    ]
    out_spec = pl.BlockSpec((None, TQ, D_pad), lambda b, q: (b, q, 0))

    return pl.pallas_call(
        kernel,
        out_shape=jax.ShapeDtypeStruct((B, S_pad, D_pad), jnp.float32),
        grid_spec=pltpu.PrefetchScalarGridSpec(
            num_scalar_prefetch=0,
            grid=(B, n_q),
            in_specs=in_specs,
            out_specs=out_spec,
            scratch_shapes=[pltpu.VMEM((S_pad, D_pad), jnp.bfloat16),   # q
                            pltpu.VMEM((S_pad, D_pad), jnp.bfloat16),   # k
                            pltpu.VMEM((S_pad, D_pad), jnp.bfloat16)],  # v
        ),
        compiler_params=pltpu.CompilerParams(
            # Query axis is "arbitrary": scratch Q/K/V persist across it.
            dimension_semantics=("parallel", "arbitrary"),
            vmem_limit_bytes=_vmem_limit_bytes(S_pad, D_pad, TQ, chunk),
        ),
    )(x_proj, x_res, prep["wqkv"], prep["bqkv"], prep["wd"], prep["bd"],
      prep["gamma"], prep["beta"])


def prepare_params(params):
    """One-time weight prep: pad D to a multiple of 128, fuse q/k/v, cast the
    MXU-facing weights to bf16.  Do this once, outside the per-call path."""
    D = params["wq"].shape[0]
    Dp = _round_up(max(D, 128), 128)

    def padw(w):   # (D, D) -> (Dp, Dp), zero padding
        return jnp.pad(w, ((0, Dp - D), (0, Dp - D)))

    def padb(b):   # (1, D) -> (1, Dp), zero padding
        return jnp.pad(b, ((0, 0), (0, Dp - D)))

    wqkv = jnp.concatenate(
        [padw(params["wq"]), padw(params["wk"]), padw(params["wv"])],
        axis=1).astype(jnp.bfloat16)                                # (Dp, 3Dp)
    bqkv = jnp.concatenate(
        [padb(params["bq"]), padb(params["bk"]), padb(params["bv"])],
        axis=1)                                                     # (1, 3Dp) f32
    return dict(
        wqkv=wqkv, bqkv=bqkv,
        wd=padw(params["wd"]).astype(jnp.bfloat16),
        bd=padb(params["bd"]),
        gamma=padb(params["gamma"]),   # zero-padded -> padded output cols are 0
        beta=padb(params["beta"]),
        dim=D, dim_pad=Dp,
    )


def self_attention_prepared(x, prep, *, max_tq=256):
    """x: (B, S, D) float32.  prep: output of prepare_params().

    max_tq: query tile ceiling.  Sweep per generation: v5e 128-256, v6e up to
    512, v7x keep 256 (64 MiB VMEM)."""
    B, S, D = x.shape
    assert D == prep["dim"], "params were prepared for a different dim"
    Dp = prep["dim_pad"]

    max_tq = max(8, (max_tq // 8) * 8)
    TQ = min(max_tq, _round_up(S, 8))
    S_pad = _round_up(S, TQ)
    chunk = _divisor_tile(S_pad, (512, 256, 128, 64, 32, 16, 8))

    if (S_pad, Dp) != (S, D):
        x_pad = jnp.pad(x, ((0, 0), (0, S_pad - S), (0, Dp - D)))
    else:
        x_pad = x
    x_proj = x_pad.astype(jnp.bfloat16)

    kwargs = dict(S_pad=S_pad, S_true=S, D_pad=Dp, D_true=D, TQ=TQ, chunk=chunk)
    try:
        out = _attention_call(x_proj, x_pad, prep, single_buffer_consts=True,
                              **kwargs)
    except Exception:
        # TODO(synk): pipeline_mode=pl.Buffered(1) unsupported on this jax
        # build; fall back to default double-buffered constant weight blocks.
        out = _attention_call(x_proj, x_pad, prep, single_buffer_consts=False,
                              **kwargs)
    return out[:, :S, :D]


def self_attention(x, params, *, max_tq=256):
    """Convenience wrapper; prefer prepare_params() once + the prepared call."""
    return self_attention_prepared(x, prepare_params(params), max_tq=max_tq)


# --------------------------------------------------------------------------- #
# Parameters / references / test
# --------------------------------------------------------------------------- #
def make_params(key, dim):
    """Deterministic synthetic parameters (torch.nn.Linear-style init,
    pre-transposed to (in, out) layout for the kernel)."""
    keys = jax.random.split(key, 8)

    def linear(kw, kb):
        bound = 1.0 / jnp.sqrt(dim)
        w = jax.random.uniform(kw, (dim, dim), jnp.float32, -bound, bound)
        b = jax.random.uniform(kb, (1, dim), jnp.float32, -bound, bound)
        return w, b

    wq, bq = linear(keys[0], keys[1])
    wk, bk = linear(keys[2], keys[3])
    wv, bv = linear(keys[4], keys[5])
    wd, bd = linear(keys[6], keys[7])
    gamma = jnp.ones((1, dim), jnp.float32)    # nn.LayerNorm default init
    beta = jnp.zeros((1, dim), jnp.float32)
    return dict(wq=wq, bq=bq, wk=wk, bk=bk, wv=wv, bv=bv,
                wd=wd, bd=bd, gamma=gamma, beta=beta)


def reference(x, p):
    """Pure-f32 reference of the torch forward pass."""
    q = x @ p["wq"] + p["bq"]
    k = x @ p["wk"] + p["bk"]
    v = x @ p["wv"] + p["bv"]
    scores = jnp.einsum("bqd,bkd->bqk", q, k)
    probs = jax.nn.softmax(scores, axis=-1)
    ctx = jnp.einsum("bqk,bkd->bqd", probs, v)
    y = ctx @ p["wd"] + p["bd"] + x
    mu = y.mean(-1, keepdims=True)
    var = ((y - mu) ** 2).mean(-1, keepdims=True)
    return (y - mu) * jax.lax.rsqrt(var + 1e-5) * p["gamma"] + p["beta"]


def reference_mixed(x, p):
    """Reference mirroring the kernel's bf16-MXU / f32-accumulate choices
    (exact division; kernel uses an approx EUP reciprocal)."""
    bf = jnp.bfloat16
    D = x.shape[-1]
    wqkv = jnp.concatenate([p["wq"], p["wk"], p["wv"]], axis=1).astype(bf)
    bqkv = jnp.concatenate([p["bq"], p["bk"], p["bv"]], axis=1)
    qkv = jnp.einsum("bsd,de->bse", x.astype(bf), wqkv,
                     preferred_element_type=jnp.float32) + bqkv
    q = qkv[..., :D].astype(bf)
    k = qkv[..., D:2 * D].astype(bf)
    v = qkv[..., 2 * D:].astype(bf)
    scores = jnp.einsum("bqd,bkd->bqk", q, k, preferred_element_type=jnp.float32)
    m = scores.max(-1, keepdims=True)
    e = jnp.exp(scores - m)
    denom = e.sum(-1, keepdims=True)
    ctx = jnp.einsum("bqk,bkd->bqd", e.astype(bf), v,
                     preferred_element_type=jnp.float32) / denom
    y = jnp.einsum("bsd,de->bse", ctx.astype(bf), p["wd"].astype(bf),
                   preferred_element_type=jnp.float32) + p["bd"] + x
    mu = y.mean(-1, keepdims=True)
    var = ((y - mu) ** 2).mean(-1, keepdims=True)
    return (y - mu) * jax.lax.rsqrt(var + 1e-5) * p["gamma"] + p["beta"]


if __name__ == "__main__":
    B, S, D = 2, 8, 32
    key = jax.random.PRNGKey(0)
    kx, kp = jax.random.split(key)
    x = jax.random.normal(kx, (B, S, D), jnp.float32)
    params = make_params(kp, D)

    prep = prepare_params(params)     # one-time fuse/pad/bf16 cast
    out = jax.block_until_ready(self_attention_prepared(x, prep))
    assert out.shape == (B, S, D)

    # Structure check against a reference with the same bf16-in / f32-acc math
    # (tolerance covers the approx-reciprocal delta flagged in review).
    ref_mixed = reference_mixed(x, params)
    assert jnp.allclose(out, ref_mixed, atol=1e-2, rtol=1e-2), \
        float(jnp.max(jnp.abs(out - ref_mixed)))
    # Envelope check against the pure-f32 torch-semantics reference; the gap is
    # the expected bf16 input-rounding error of the MXU path.
    ref_f32 = reference(x, params)
    assert jnp.allclose(out, ref_f32, atol=5e-2, rtol=5e-2), \
        float(jnp.max(jnp.abs(out - ref_f32)))
    print("KERNEL_OK")
</pallas_src>

<mosaic_0001>
module attributes {stable_mosaic.version = 11 : i64} {
  func.func @kernel(%arg0: i32, %arg1: i32, %arg2: memref<1x8x128xbf16, #tpu.memory_space<vmem>>, %arg3: memref<1x8x128xf32, #tpu.memory_space<vmem>>, %arg4: memref<128x384xbf16, #tpu.memory_space<vmem>>, %arg5: memref<1x384xf32, #tpu.memory_space<vmem>>, %arg6: memref<128x128xbf16, #tpu.memory_space<vmem>>, %arg7: memref<1x128xf32, #tpu.memory_space<vmem>>, %arg8: memref<1x128xf32, #tpu.memory_space<vmem>>, %arg9: memref<1x128xf32, #tpu.memory_space<vmem>>, %arg10: memref<1x8x128xf32, #tpu.memory_space<vmem>>, %arg11: memref<8x128xbf16, #tpu.memory_space<vmem>>, %arg12: memref<8x128xbf16, #tpu.memory_space<vmem>>, %arg13: memref<8x128xbf16, #tpu.memory_space<vmem>>) attributes {dimension_semantics = [#tpu.dimension_semantics<parallel>, #tpu.dimension_semantics<arbitrary>], iteration_bounds = array<i64: 2, 1>, scalar_prefetch = 0 : i64, scratch_operands = 3 : i64, tpu.core_type = #tpu.core_type<tc>, window_params = [{transform_indices = @transform_0, window_bounds = array<i64: 1, 8, 128>}, {transform_indices = @transform_1, window_bounds = array<i64: 1, 8, 128>}, {pipeline_mode = #tpu.pipeline_mode<synchronous>, transform_indices = @transform_2, window_bounds = array<i64: 128, 384>}, {pipeline_mode = #tpu.pipeline_mode<synchronous>, transform_indices = @transform_3, window_bounds = array<i64: 1, 384>}, {pipeline_mode = #tpu.pipeline_mode<synchronous>, transform_indices = @transform_4, window_bounds = array<i64: 128, 128>}, {pipeline_mode = #tpu.pipeline_mode<synchronous>, transform_indices = @transform_5, window_bounds = array<i64: 1, 128>}, {pipeline_mode = #tpu.pipeline_mode<synchronous>, transform_indices = @transform_6, window_bounds = array<i64: 1, 128>}, {pipeline_mode = #tpu.pipeline_mode<synchronous>, transform_indices = @transform_7, window_bounds = array<i64: 1, 128>}, {transform_indices = @transform_8, window_bounds = array<i64: 1, 8, 128>}]} {
    %c0_i32 = arith.constant 0 : i32
    %0 = arith.cmpi eq, %arg1, %c0_i32 : i32
    %1 = arith.extui %0 : i1 to i32
    %c0_i32_0 = arith.constant 0 : i32
    %2 = arith.cmpi ne, %1, %c0_i32_0 : i32
    scf.if %2 {
      %c0_i32_28 = arith.constant 0 : i32
      %58 = tpu.assume_multiple %c0_i32_28, 8 : i32
      %c0_29 = arith.constant 0 : index
      %59 = arith.index_cast %58 : i32 to index
      %c0_30 = arith.constant 0 : index
      %60 = vector.load %arg2[%c0_29, %59, %c0_30] : memref<1x8x128xbf16, #tpu.memory_space<vmem>>, vector<1x8x128xbf16>
      %61 = vector.shape_cast %60 : vector<1x8x128xbf16> to vector<8x128xbf16>
      %c0_31 = arith.constant 0 : index
      %c0_32 = arith.constant 0 : index
      %62 = vector.load %arg4[%c0_31, %c0_32] : memref<128x384xbf16, #tpu.memory_space<vmem>>, vector<128x384xbf16>
      %cst_33 = arith.constant dense<0.000000e+00> : vector<8x384xf32>
      %63 = tpu.matmul %61, %62, %cst_33 {dimension_numbers = #tpu.dot_dimension_numbers<[1], [0], [0], [1], [0, 0, 1, 1], [], []>} : vector<8x128xbf16>, vector<128x384xbf16>, vector<8x384xf32> -> vector<8x384xf32>
      %c0_34 = arith.constant 0 : index
      %c0_35 = arith.constant 0 : index
      %64 = vector.load %arg5[%c0_34, %c0_35] : memref<1x384xf32, #tpu.memory_space<vmem>>, vector<1x384xf32>
      %65 = vector.broadcast %64 : vector<1x384xf32> to vector<8x384xf32>
      %66 = arith.addf %63, %65 : vector<8x384xf32>
      %67 = vector.extract_strided_slice %66 {offsets = [0, 0], sizes = [8, 128], strides = [1, 1]} : vector<8x384xf32> to vector<8x128xf32>
      %68 = arith.truncf %67 : vector<8x128xf32> to vector<8x128xbf16>
      %69 = arith.index_cast %58 : i32 to index
      %c0_36 = arith.constant 0 : index
      %70 = vector.load %arg11[%69, %c0_36] : memref<8x128xbf16, #tpu.memory_space<vmem>>, vector<8x128xbf16>
      tpu.vector_store %arg11[%69, %c0_36], %68 {strides = array<i32>} : memref<8x128xbf16, #tpu.memory_space<vmem>>, vector<8x128xbf16>,
      %71 = vector.extract_strided_slice %66 {offsets = [0, 128], sizes = [8, 128], strides = [1, 1]} : vector<8x384xf32> to vector<8x128xf32>
      %72 = arith.truncf %71 : vector<8x128xf32> to vector<8x128xbf16>
      %73 = arith.index_cast %58 : i32 to index
      %c0_37 = arith.constant 0 : index
      %74 = vector.load %arg12[%73, %c0_37] : memref<8x128xbf16, #tpu.memory_space<vmem>>, vector<8x128xbf16>
      tpu.vector_store %arg12[%73, %c0_37], %72 {strides = array<i32>} : memref<8x128xbf16, #tpu.memory_space<vmem>>, vector<8x128xbf16>,
      %75 = vector.extract_strided_slice %66 {offsets = [0, 256], sizes = [8, 128], strides = [1, 1]} : vector<8x384xf32> to vector<8x128xf32>
      %76 = arith.truncf %75 : vector<8x128xf32> to vector<8x128xbf16>
      %77 = arith.index_cast %58 : i32 to index
      %c0_38 = arith.constant 0 : index
      %78 = vector.load %arg13[%77, %c0_38] : memref<8x128xbf16, #tpu.memory_space<vmem>>, vector<8x128xbf16>
      tpu.vector_store %arg13[%77, %c0_38], %76 {strides = array<i32>} : memref<8x128xbf16, #tpu.memory_space<vmem>>, vector<8x128xbf16>,
    } else {
    }
    %c8_i32 = arith.constant 8 : i32
    %3 = arith.muli %arg1, %c8_i32 : i32
    %4 = tpu.assume_multiple %3, 8 : i32
    %5 = arith.index_cast %4 : i32 to index
    %c0 = arith.constant 0 : index
    %6 = vector.load %arg11[%5, %c0] : memref<8x128xbf16, #tpu.memory_space<vmem>>, vector<8x128xbf16>
    %c0_1 = arith.constant 0 : index
    %c0_2 = arith.constant 0 : index
    %7 = vector.load %arg12[%c0_1, %c0_2] : memref<8x128xbf16, #tpu.memory_space<vmem>>, vector<8x128xbf16>
    %cst = arith.constant dense<0.000000e+00> : vector<8x8xf32>
    %8 = tpu.matmul %6, %7, %cst {dimension_numbers = #tpu.dot_dimension_numbers<[1], [1], [0], [0], [0, 0, 1, 0], [], []>} : vector<8x128xbf16>, vector<8x128xbf16>, vector<8x8xf32> -> vector<8x8xf32>
    %cst_3 = arith.constant dense<0xFF800000> : vector<8xf32>
    %9 = vector.multi_reduction <maximumf>, %8, %cst_3 [1] : vector<8x8xf32> to vector<8xf32>
    %10 = vector.shape_cast %9 : vector<8xf32> to vector<8x1xf32>
    %11 = vector.broadcast %10 : vector<8x1xf32> to vector<8x8xf32>
    %12 = arith.subf %8, %11 : vector<8x8xf32>
    %13 = math.exp %12 : vector<8x8xf32>
    %cst_4 = arith.constant dense<0.000000e+00> : vector<8xf32>
    %14 = vector.multi_reduction <add>, %13, %cst_4 [1] : vector<8x8xf32> to vector<8xf32>
    %15 = vector.shape_cast %14 : vector<8xf32> to vector<8x1xf32>
    %16 = arith.truncf %13 : vector<8x8xf32> to vector<8x8xbf16>
    %c0_5 = arith.constant 0 : index
    %c0_6 = arith.constant 0 : index
    %17 = vector.load %arg13[%c0_5, %c0_6] : memref<8x128xbf16, #tpu.memory_space<vmem>>, vector<8x128xbf16>
    %cst_7 = arith.constant dense<0.000000e+00> : vector<8x128xf32>
    %18 = tpu.matmul %16, %17, %cst_7 {dimension_numbers = #tpu.dot_dimension_numbers<[1], [0], [0], [1], [0, 0, 1, 1], [], []>} : vector<8x8xbf16>, vector<8x128xbf16>, vector<8x128xf32> -> vector<8x128xf32>
    %19 = tpu.reciprocal %15 {approx = true} : vector<8x1xf32> -> vector<8x1xf32>
    %20 = vector.broadcast %19 : vector<8x1xf32> to vector<8x128xf32>
    %21 = arith.mulf %18, %20 : vector<8x128xf32>
    %22 = arith.truncf %21 : vector<8x128xf32> to vector<8x128xbf16>
    %c0_8 = arith.constant 0 : index
    %c0_9 = arith.constant 0 : index
    %23 = vector.load %arg6[%c0_8, %c0_9] : memref<128x128xbf16, #tpu.memory_space<vmem>>, vector<128x128xbf16>
    %cst_10 = arith.constant dense<0.000000e+00> : vector<8x128xf32>
    %24 = tpu.matmul %22, %23, %cst_10 {dimension_numbers = #tpu.dot_dimension_numbers<[1], [0], [0], [1], [0, 0, 1, 1], [], []>} : vector<8x128xbf16>, vector<128x128xbf16>, vector<8x128xf32> -> vector<8x128xf32>
    %c0_11 = arith.constant 0 : index
    %c0_12 = arith.constant 0 : index
    %25 = vector.load %arg7[%c0_11, %c0_12] : memref<1x128xf32, #tpu.memory_space<vmem>>, vector<1x128xf32>
    %26 = vector.broadcast %25 : vector<1x128xf32> to vector<8x128xf32>
    %27 = arith.addf %24, %26 : vector<8x128xf32>
    %c0_13 = arith.constant 0 : index
    %c0_14 = arith.constant 0 : index
    %c0_15 = arith.constant 0 : index
    %28 = vector.load %arg3[%c0_13, %c0_14, %c0_15] : memref<1x8x128xf32, #tpu.memory_space<vmem>>, vector<1x8x128xf32>
    %29 = vector.shape_cast %28 : vector<1x8x128xf32> to vector<8x128xf32>
    %30 = arith.addf %27, %29 : vector<8x128xf32>
    %cst_16 = arith.constant dense<0.000000e+00> : vector<8xf32>
    %31 = vector.multi_reduction <add>, %30, %cst_16 [1] : vector<8x128xf32> to vector<8xf32>
    %32 = vector.shape_cast %31 : vector<8xf32> to vector<8x1xf32>
    %cst_17 = arith.constant 3.125000e-02 : f32
    %33 = vector.broadcast %cst_17 : f32 to vector<8x1xf32>
    %34 = arith.mulf %32, %33 : vector<8x1xf32>
    %35 = arith.mulf %30, %30 : vector<8x128xf32>
    %cst_18 = arith.constant dense<0.000000e+00> : vector<8xf32>
    %36 = vector.multi_reduction <add>, %35, %cst_18 [1] : vector<8x128xf32> to vector<8xf32>
    %37 = vector.shape_cast %36 : vector<8xf32> to vector<8x1xf32>
    %cst_19 = arith.constant 3.125000e-02 : f32
    %38 = vector.broadcast %cst_19 : f32 to vector<8x1xf32>
    %39 = arith.mulf %37, %38 : vector<8x1xf32>
    %40 = arith.mulf %34, %34 : vector<8x1xf32>
    %41 = arith.subf %39, %40 : vector<8x1xf32>
    %42 = vector.broadcast %34 : vector<8x1xf32> to vector<8x128xf32>
    %43 = arith.subf %30, %42 : vector<8x128xf32>
    %cst_20 = arith.constant 9.99999974E-6 : f32
    %44 = vector.broadcast %cst_20 : f32 to vector<8x1xf32>
    %45 = arith.addf %41, %44 : vector<8x1xf32>
    %46 = math.rsqrt %45 : vector<8x1xf32>
    %47 = vector.broadcast %46 : vector<8x1xf32> to vector<8x128xf32>
    %48 = arith.mulf %43, %47 : vector<8x128xf32>
    %c0_21 = arith.constant 0 : index
    %c0_22 = arith.constant 0 : index
    %49 = vector.load %arg8[%c0_21, %c0_22] : memref<1x128xf32, #tpu.memory_space<vmem>>, vector<1x128xf32>
    %50 = vector.broadcast %49 : vector<1x128xf32> to vector<8x128xf32>
    %51 = arith.mulf %48, %50 : vector<8x128xf32>
    %c0_23 = arith.constant 0 : index
    %c0_24 = arith.constant 0 : index
    %52 = vector.load %arg9[%c0_23, %c0_24] : memref<1x128xf32, #tpu.memory_space<vmem>>, vector<1x128xf32>
    %53 = vector.broadcast %52 : vector<1x128xf32> to vector<8x128xf32>
    %54 = arith.addf %51, %53 : vector<8x128xf32>
    %c0_25 = arith.constant 0 : index
    %c0_26 = arith.constant 0 : index
    %c0_27 = arith.constant 0 : index
    %55 = vector.load %arg10[%c0_25, %c0_26, %c0_27] : memref<1x8x128xf32, #tpu.memory_space<vmem>>, vector<1x8x128xf32>
    %56 = vector.shape_cast %55 : vector<1x8x128xf32> to vector<8x128xf32>
    %57 = vector.shape_cast %54 : vector<8x128xf32> to vector<1x8x128xf32>
    tpu.vector_store %arg10[%c0_25, %c0_26, %c0_27], %57 {strides = array<i32>} : memref<1x8x128xf32, #tpu.memory_space<vmem>>, vector<1x8x128xf32>,
    return
  }
  func.func @transform_0(%arg0: i32, %arg1: i32) -> (i32, i32, i32) {
    %c0_i32 = arith.constant 0 : i32
    %c0_i32_0 = arith.constant 0 : i32
    %c0_i32_1 = arith.constant 0 : i32
    return %arg0, %c0_i32, %c0_i32_0 : i32, i32, i32
  }
  func.func @transform_1(%arg0: i32, %arg1: i32) -> (i32, i32, i32) {
    %c0_i32 = arith.constant 0 : i32
    %c0_i32_0 = arith.constant 0 : i32
    return %arg0, %arg1, %c0_i32 : i32, i32, i32
  }
  func.func @transform_2(%arg0: i32, %arg1: i32) -> (i32, i32) {
    %c0_i32 = arith.constant 0 : i32
    %c0_i32_0 = arith.constant 0 : i32
    %c0_i32_1 = arith.constant 0 : i32
    return %c0_i32, %c0_i32_0 : i32, i32
  }
  func.func @transform_3(%arg0: i32, %arg1: i32) -> (i32, i32) {
    %c0_i32 = arith.constant 0 : i32
    %c0_i32_0 = arith.constant 0 : i32
    %c0_i32_1 = arith.constant 0 : i32
    return %c0_i32, %c0_i32_0 : i32, i32
  }
  func.func @transform_4(%arg0: i32, %arg1: i32) -> (i32, i32) {
    %c0_i32 = arith.constant 0 : i32
    %c0_i32_0 = arith.constant 0 : i32
    %c0_i32_1 = arith.constant 0 : i32
    return %c0_i32, %c0_i32_0 : i32, i32
  }
  func.func @transform_5(%arg0: i32, %arg1: i32) -> (i32, i32) {
    %c0_i32 = arith.constant 0 : i32
    %c0_i32_0 = arith.constant 0 : i32
    %c0_i32_1 = arith.constant 0 : i32
    return %c0_i32, %c0_i32_0 : i32, i32
  }
  func.func @transform_6(%arg0: i32, %arg1: i32) -> (i32, i32) {
    %c0_i32 = arith.constant 0 : i32
    %c0_i32_0 = arith.constant 0 : i32
    %c0_i32_1 = arith.constant 0 : i32
    return %c0_i32, %c0_i32_0 : i32, i32
  }
  func.func @transform_7(%arg0: i32, %arg1: i32) -> (i32, i32) {
    %c0_i32 = arith.constant 0 : i32
    %c0_i32_0 = arith.constant 0 : i32
    %c0_i32_1 = arith.constant 0 : i32
    return %c0_i32, %c0_i32_0 : i32, i32
  }
  func.func @transform_8(%arg0: i32, %arg1: i32) -> (i32, i32, i32) {
    %c0_i32 = arith.constant 0 : i32
    %c0_i32_0 = arith.constant 0 : i32
    return %arg0, %arg1, %c0_i32 : i32, i32, i32
  }
}

module attributes {stable_mosaic.version = 11 : i64} {
  func.func @kernel(%arg0: i32, %arg1: i32, %arg2: memref<1x8x128xbf16, #tpu.memory_space<vmem>>, %arg3: memref<1x8x128xf32, #tpu.memory_space<vmem>>, %arg4: memref<128x384xbf16, #tpu.memory_space<vmem>>, %arg5: memref<1x384xf32, #tpu.memory_space<vmem>>, %arg6: memref<128x128xbf16, #tpu.memory_space<vmem>>, %arg7: memref<1x128xf32, #tpu.memory_space<vmem>>, %arg8: memref<1x128xf32, #tpu.memory_space<vmem>>, %arg9: memref<1x128xf32, #tpu.memory_space<vmem>>, %arg10: memref<1x8x128xf32, #tpu.memory_space<vmem>>, %arg11: memref<8x128xbf16, #tpu.memory_space<vmem>>, %arg12: memref<8x128xbf16, #tpu.memory_space<vmem>>, %arg13: memref<8x128xbf16, #tpu.memory_space<vmem>>) attributes {dimension_semantics = [#tpu.dimension_semantics<parallel>, #tpu.dimension_semantics<arbitrary>], iteration_bounds = array<i64: 2, 1>, scalar_prefetch = 0 : i64, scratch_operands = 3 : i64, tpu.core_type = #tpu.core_type<tc>, window_params = [{transform_indices = @transform_0, window_bounds = array<i64: 1, 8, 128>}, {transform_indices = @transform_1, window_bounds = array<i64: 1, 8, 128>}, {pipeline_mode = #tpu.pipeline_mode<synchronous>, transform_indices = @transform_2, window_bounds = array<i64: 128, 384>}, {pipeline_mode = #tpu.pipeline_mode<synchronous>, transform_indices = @transform_3, window_bounds = array<i64: 1, 384>}, {pipeline_mode = #tpu.pipeline_mode<synchronous>, transform_indices = @transform_4, window_bounds = array<i64: 128, 128>}, {pipeline_mode = #tpu.pipeline_mode<synchronous>, transform_indices = @transform_5, window_bounds = array<i64: 1, 128>}, {pipeline_mode = #tpu.pipeline_mode<synchronous>, transform_indices = @transform_6, window_bounds = array<i64: 1, 128>}, {pipeline_mode = #tpu.pipeline_mode<synchronous>, transform_indices = @transform_7, window_bounds = array<i64: 1, 128>}, {transform_indices = @transform_8, window_bounds = array<i64: 1, 8, 128>}]} {
    %c0_i32 = arith.constant 0 : i32
    %0 = arith.cmpi eq, %arg1, %c0_i32 : i32
    %1 = arith.extui %0 : i1 to i32
    %c0_i32_0 = arith.constant 0 : i32
    %2 = arith.cmpi ne, %1, %c0_i32_0 : i32
    scf.if %2 {
      %c0_i32_28 = arith.constant 0 : i32
      %58 = tpu.assume_multiple %c0_i32_28, 8 : i32
      %c0_29 = arith.constant 0 : index
      %59 = arith.index_cast %58 : i32 to index
      %c0_30 = arith.constant 0 : index
      %60 = vector.load %arg2[%c0_29, %59, %c0_30] : memref<1x8x128xbf16, #tpu.memory_space<vmem>>, vector<1x8x128xbf16>
      %61 = vector.shape_cast %60 : vector<1x8x128xbf16> to vector<8x128xbf16>
      %c0_31 = arith.constant 0 : index
      %c0_32 = arith.constant 0 : index
      %62 = vector.load %arg4[%c0_31, %c0_32] : memref<128x384xbf16, #tpu.memory_space<vmem>>, vector<128x384xbf16>
      %cst_33 = arith.constant dense<0.000000e+00> : vector<8x384xf32>
      %63 = tpu.matmul %61, %62, %cst_33 {dimension_numbers = #tpu.dot_dimension_numbers<[1], [0], [0], [1], [0, 0, 1, 1], [], []>} : vector<8x128xbf16>, vector<128x384xbf16>, vector<8x384xf32> -> vector<8x384xf32>
      %c0_34 = arith.constant 0 : index
      %c0_35 = arith.constant 0 : index
      %64 = vector.load %arg5[%c0_34, %c0_35] : memref<1x384xf32, #tpu.memory_space<vmem>>, vector<1x384xf32>
      %65 = vector.broadcast %64 : vector<1x384xf32> to vector<8x384xf32>
      %66 = arith.addf %63, %65 : vector<8x384xf32>
      %67 = vector.extract_strided_slice %66 {offsets = [0, 0], sizes = [8, 128], strides = [1, 1]} : vector<8x384xf32> to vector<8x128xf32>
      %68 = arith.truncf %67 : vector<8x128xf32> to vector<8x128xbf16>
      %69 = arith.index_cast %58 : i32 to index
      %c0_36 = arith.constant 0 : index
      %70 = vector.load %arg11[%69, %c0_36] : memref<8x128xbf16, #tpu.memory_space<vmem>>, vector<8x128xbf16>
      tpu.vector_store %arg11[%69, %c0_36], %68 {strides = array<i32>} : memref<8x128xbf16, #tpu.memory_space<vmem>>, vector<8x128xbf16>,
      %71 = vector.extract_strided_slice %66 {offsets = [0, 128], sizes = [8, 128], strides = [1, 1]} : vector<8x384xf32> to vector<8x128xf32>
      %72 = arith.truncf %71 : vector<8x128xf32> to vector<8x128xbf16>
      %73 = arith.index_cast %58 : i32 to index
      %c0_37 = arith.constant 0 : index
      %74 = vector.load %arg12[%73, %c0_37] : memref<8x128xbf16, #tpu.memory_space<vmem>>, vector<8x128xbf16>
      tpu.vector_store %arg12[%73, %c0_37], %72 {strides = array<i32>} : memref<8x128xbf16, #tpu.memory_space<vmem>>, vector<8x128xbf16>,
      %75 = vector.extract_strided_slice %66 {offsets = [0, 256], sizes = [8, 128], strides = [1, 1]} : vector<8x384xf32> to vector<8x128xf32>
      %76 = arith.truncf %75 : vector<8x128xf32> to vector<8x128xbf16>
      %77 = arith.index_cast %58 : i32 to index
      %c0_38 = arith.constant 0 : index
      %78 = vector.load %arg13[%77, %c0_38] : memref<8x128xbf16, #tpu.memory_space<vmem>>, vector<8x128xbf16>
      tpu.vector_store %arg13[%77, %c0_38], %76 {strides = array<i32>} : memref<8x128xbf16, #tpu.memory_space<vmem>>, vector<8x128xbf16>,
    } else {
    }
    %c8_i32 = arith.constant 8 : i32
    %3 = arith.muli %arg1, %c8_i32 : i32
    %4 = tpu.assume_multiple %3, 8 : i32
    %5 = arith.index_cast %4 : i32 to index
    %c0 = arith.constant 0 : index
    %6 = vector.load %arg11[%5, %c0] : memref<8x128xbf16, #tpu.memory_space<vmem>>, vector<8x128xbf16>
    %c0_1 = arith.constant 0 : index
    %c0_2 = arith.constant 0 : index
    %7 = vector.load %arg12[%c0_1, %c0_2] : memref<8x128xbf16, #tpu.memory_space<vmem>>, vector<8x128xbf16>
    %cst = arith.constant dense<0.000000e+00> : vector<8x8xf32>
    %8 = tpu.matmul %6, %7, %cst {dimension_numbers = #tpu.dot_dimension_numbers<[1], [1], [0], [0], [0, 0, 1, 0], [], []>} : vector<8x128xbf16>, vector<8x128xbf16>, vector<8x8xf32> -> vector<8x8xf32>
    %cst_3 = arith.constant dense<0xFF800000> : vector<8xf32>
    %9 = vector.multi_reduction <maximumf>, %8, %cst_3 [1] : vector<8x8xf32> to vector<8xf32>
    %10 = vector.shape_cast %9 : vector<8xf32> to vector<8x1xf32>
    %11 = vector.broadcast %10 : vector<8x1xf32> to vector<8x8xf32>
    %12 = arith.subf %8, %11 : vector<8x8xf32>
    %13 = math.exp %12 : vector<8x8xf32>
    %cst_4 = arith.constant dense<0.000000e+00> : vector<8xf32>
    %14 = vector.multi_reduction <add>, %13, %cst_4 [1] : vector<8x8xf32> to vector<8xf32>
    %15 = vector.shape_cast %14 : vector<8xf32> to vector<8x1xf32>
    %16 = arith.truncf %13 : vector<8x8xf32> to vector<8x8xbf16>
    %c0_5 = arith.constant 0 : index
    %c0_6 = arith.constant 0 : index
    %17 = vector.load %arg13[%c0_5, %c0_6] : memref<8x128xbf16, #tpu.memory_space<vmem>>, vector<8x128xbf16>
    %cst_7 = arith.constant dense<0.000000e+00> : vector<8x128xf32>
    %18 = tpu.matmul %16, %17, %cst_7 {dimension_numbers = #tpu.dot_dimension_numbers<[1], [0], [0], [1], [0, 0, 1, 1], [], []>} : vector<8x8xbf16>, vector<8x128xbf16>, vector<8x128xf32> -> vector<8x128xf32>
    %19 = tpu.reciprocal %15 {approx = true} : vector<8x1xf32> -> vector<8x1xf32>
    %20 = vector.broadcast %19 : vector<8x1xf32> to vector<8x128xf32>
    %21 = arith.mulf %18, %20 : vector<8x128xf32>
    %22 = arith.truncf %21 : vector<8x128xf32> to vector<8x128xbf16>
    %c0_8 = arith.constant 0 : index
    %c0_9 = arith.constant 0 : index
    %23 = vector.load %arg6[%c0_8, %c0_9] : memref<128x128xbf16, #tpu.memory_space<vmem>>, vector<128x128xbf16>
    %cst_10 = arith.constant dense<0.000000e+00> : vector<8x128xf32>
    %24 = tpu.matmul %22, %23, %cst_10 {dimension_numbers = #tpu.dot_dimension_numbers<[1], [0], [0], [1], [0, 0, 1, 1], [], []>} : vector<8x128xbf16>, vector<128x128xbf16>, vector<8x128xf32> -> vector<8x128xf32>
    %c0_11 = arith.constant 0 : index
    %c0_12 = arith.constant 0 : index
    %25 = vector.load %arg7[%c0_11, %c0_12] : memref<1x128xf32, #tpu.memory_space<vmem>>, vector<1x128xf32>
    %26 = vector.broadcast %25 : vector<1x128xf32> to vector<8x128xf32>
    %27 = arith.addf %24, %26 : vector<8x128xf32>
    %c0_13 = arith.constant 0 : index
    %c0_14 = arith.constant 0 : index
    %c0_15 = arith.constant 0 : index
    %28 = vector.load %arg3[%c0_13, %c0_14, %c0_15] : memref<1x8x128xf32, #tpu.memory_space<vmem>>, vector<1x8x128xf32>
    %29 = vector.shape_cast %28 : vector<1x8x128xf32> to vector<8x128xf32>
    %30 = arith.addf %27, %29 : vector<8x128xf32>
    %cst_16 = arith.constant dense<0.000000e+00> : vector<8xf32>
    %31 = vector.multi_reduction <add>, %30, %cst_16 [1] : vector<8x128xf32> to vector<8xf32>
    %32 = vector.shape_cast %31 : vector<8xf32> to vector<8x1xf32>
    %cst_17 = arith.constant 3.125000e-02 : f32
    %33 = vector.broadcast %cst_17 : f32 to vector<8x1xf32>
    %34 = arith.mulf %32, %33 : vector<8x1xf32>
    %35 = arith.mulf %30, %30 : vector<8x128xf32>
    %cst_18 = arith.constant dense<0.000000e+00> : vector<8xf32>
    %36 = vector.multi_reduction <add>, %35, %cst_18 [1] : vector<8x128xf32> to vector<8xf32>
    %37 = vector.shape_cast %36 : vector<8xf32> to vector<8x1xf32>
    %cst_19 = arith.constant 3.125000e-02 : f32
    %38 = vector.broadcast %cst_19 : f32 to vector<8x1xf32>
    %39 = arith.mulf %37, %38 : vector<8x1xf32>
    %40 = arith.mulf %34, %34 : vector<8x1xf32>
    %41 = arith.subf %39, %40 : vector<8x1xf32>
    %42 = vector.broadcast %34 : vector<8x1xf32> to vector<8x128xf32>
    %43 = arith.subf %30, %42 : vector<8x128xf32>
    %cst_20 = arith.constant 9.99999974E-6 : f32
    %44 = vector.broadcast %cst_20 : f32 to vector<8x1xf32>
    %45 = arith.addf %41, %44 : vector<8x1xf32>
    %46 = math.rsqrt %45 : vector<8x1xf32>
    %47 = vector.broadcast %46 : vector<8x1xf32> to vector<8x128xf32>
    %48 = arith.mulf %43, %47 : vector<8x128xf32>
    %c0_21 = arith.constant 0 : index
    %c0_22 = arith.constant 0 : index
    %49 = vector.load %arg8[%c0_21, %c0_22] : memref<1x128xf32, #tpu.memory_space<vmem>>, vector<1x128xf32>
    %50 = vector.broadcast %49 : vector<1x128xf32> to vector<8x128xf32>
    %51 = arith.mulf %48, %50 : vector<8x128xf32>
    %c0_23 = arith.constant 0 : index
    %c0_24 = arith.constant 0 : index
    %52 = vector.load %arg9[%c0_23, %c0_24] : memref<1x128xf32, #tpu.memory_space<vmem>>, vector<1x128xf32>
    %53 = vector.broadcast %52 : vector<1x128xf32> to vector<8x128xf32>
    %54 = arith.addf %51, %53 : vector<8x128xf32>
    %c0_25 = arith.constant 0 : index
    %c0_26 = arith.constant 0 : index
    %c0_27 = arith.constant 0 : index
    %55 = vector.load %arg10[%c0_25, %c0_26, %c0_27] : memref<1x8x128xf32, #tpu.memory_space<vmem>>, vector<1x8x128xf32>
    %56 = vector.shape_cast %55 : vector<1x8x128xf32> to vector<8x128xf32>
    %57 = vector.shape_cast %54 : vector<8x128xf32> to vector<1x8x128xf32>
    tpu.vector_store %arg10[%c0_25, %c0_26, %c0_27], %57 {strides = array<i32>} : memref<1x8x128xf32, #tpu.memory_space<vmem>>, vector<1x8x128xf32>,
    return
  }
  func.func @transform_0(%arg0: i32, %arg1: i32) -> (i32, i32, i32) {
    %c0_i32 = arith.constant 0 : i32
    %c0_i32_0 = arith.constant 0 : i32
    %c0_i32_1 = arith.constant 0 : i32
    return %arg0, %c0_i32, %c0_i32_0 : i32, i32, i32
  }
  func.func @transform_1(%arg0: i32, %arg1: i32) -> (i32, i32, i32) {
    %c0_i32 = arith.constant 0 : i32
    %c0_i32_0 = arith.constant 0 : i32
    return %arg0, %arg1, %c0_i32 : i32, i32, i32
  }
  func.func @transform_2(%arg0: i32, %arg1: i32) -> (i32, i32) {
    %c0_i32 = arith.constant 0 : i32
    %c0_i32_0 = arith.constant 0 : i32
    %c0_i32_1 = arith.constant 0 : i32
    return %c0_i32, %c0_i32_0 : i32, i32
  }
  func.func @transform_3(%arg0: i32, %arg1: i32) -> (i32, i32) {
    %c0_i32 = arith.constant 0 : i32
    %c0_i32_0 = arith.constant 0 : i32
    %c0_i32_1 = arith.constant 0 : i32
    return %c0_i32, %c0_i32_0 : i32, i32
  }
  func.func @transform_4(%arg0: i32, %arg1: i32) -> (i32, i32) {
    %c0_i32 = arith.constant 0 : i32
    %c0_i32_0 = arith.constant 0 : i32
    %c0_i32_1 = arith.constant 0 : i32
    return %c0_i32, %c0_i32_0 : i32, i32
  }
  func.func @transform_5(%arg0: i32, %arg1: i32) -> (i32, i32) {
    %c0_i32 = arith.constant 0 : i32
    %c0_i32_0 = arith.constant 0 : i32
    %c0_i32_1 = arith.constant 0 : i32
    return %c0_i32, %c0_i32_0 : i32, i32
  }
  func.func @transform_6(%arg0: i32, %arg1: i32) -> (i32, i32) {
    %c0_i32 = arith.constant 0 : i32
    %c0_i32_0 = arith.constant 0 : i32
    %c0_i32_1 = arith.constant 0 : i32
    return %c0_i32, %c0_i32_0 : i32, i32
  }
  func.func @transform_7(%arg0: i32, %arg1: i32) -> (i32, i32) {
    %c0_i32 = arith.constant 0 : i32
    %c0_i32_0 = arith.constant 0 : i32
    %c0_i32_1 = arith.constant 0 : i32
    return %c0_i32, %c0_i32_0 : i32, i32
  }
  func.func @transform_8(%arg0: i32, %arg1: i32) -> (i32, i32, i32) {
    %c0_i32 = arith.constant 0 : i32
    %c0_i32_0 = arith.constant 0 : i32
    return %arg0, %arg1, %c0_i32 : i32, i32, i32
  }
}

</mosaic_0001>

<bundles_post_ra>
// kernel: tpu_custom_call.1
= control target key start
LH: loop header
LB: loop body
LE: loop exit
PB: predicated region body
PF: predicated region fallthrough
CT: control target
= control target key end

     0   :  { %s1841_s0 = inlined_call_operand.hbm [shape: bf16[2,8,128], index: 0, kind: input, shape index: {}]   ;;  %s1842_s1 = inlined_call_operand.hbm [shape: f32[2,8,128], index: 1, kind: input, shape index: {}]   ;;  %s1843_s2 = inlined_call_operand.hbm [shape: bf16[128,384], index: 2, kind: input, shape index: {}]   ;;  %s1844_s3 = inlined_call_operand.vmem [shape: f32[1,384], index: 3, kind: input, shape index: {}]   ;;  %s1845_s4 = inlined_call_operand.hbm [shape: bf16[128,128], index: 4, kind: input, shape index: {}]   ;;  %s1846_s5 = inlined_call_operand.vmem [shape: f32[1,128], index: 5, kind: input, shape index: {}]   ;;  %s1847_s6 = inlined_call_operand.vmem [shape: f32[1,128], index: 6, kind: input, shape index: {}]   ;;  %s1848_s7 = inlined_call_operand.vmem [shape: f32[1,128], index: 7, kind: input, shape index: {}]   ;;  %s1849_s8 = inlined_call_operand.hbm [shape: f32[2,8,128], index: 8, kind: output, shape index: {}]  }
   0x1   :  { %1856 = sst [smem:[#allocation24_spill]] %s1841_s0 }
   0x2   :  { %1857 = sst [smem:[#allocation25_spill]] %s1843_s2 }
   0x3   :  { %1858 = sst [smem:[#allocation26_spill]] %s1845_s4 }
   0x4   :  { %13 = vsyncpa [#allocation6], 0 }
   0x5   :  { %15 = vsyncpa [#allocation6 + $0x1], 0 }
   0x6   :  { %16 = vsyncpa [#allocation9], 0 }
   0x7   :  { %18 = vsyncpa [#allocation9 + $0x1], 0 }
   0x8   :  { %19 = vsyncpa [#allocation12], 0 }
   0x9   :  { %20 = vsyncpa [#allocation7], 0 }
   0xa   :  { %22 = vsyncpa [#allocation7 + $0x1], 0  ;;  %s1595_s27 = smov 0   ;;  %s1597_s28 = smov 0  }
   0xb   :  { %s1599_s29 = smov 0   ;;  %s1601_s30 = smov 0  }
   0xc   :  { %s1603_s9 = smov 0   ;;  %s1605_s10 = smov 0  }
   0xd LB: > { %1859 = sst [smem:[#allocation19_spill]] %s1524_s29  ;;  %s1626_s11 = sadd.s32 4294967295, %s1536_s10   ;;  %s1536_s10 = sphi %s1605_s10, %s28_s10   ;;  %s1532_s9 = sphi %s1603_s9, %s1888_s9   ;;  %s1528_s30 = sphi %s1601_s30, %s1887_s30   ;;  %s1524_s29 = sphi %s1599_s29, %s1883_s29   ;;  %s1520_s28 = sphi %s1597_s28, %s1886_s28   ;;  %s1516_s27 = sphi %s1595_s27, %s1885_s27  }
   0xe   : > { %1860 = sst [smem:[#allocation20_spill]] %s1536_s10  ;;  %s1066_s12 = sadd.s32 4294967294, %s1536_s10  }
   0xf   : > { %p60_p0 = scmp.ne.s32.totalorder %s1520_s28, %s1516_s27  ;;  %p1850_p1 = scmp.eq.s32.totalorder %s1626_s11, 0 }
  0x10   : > { %p246_p3 = scmp.eq.s32.totalorder %s1066_s12, 1  ;;  %p1067_p5 = scmp.ge.s32.totalorder %s1536_s10, 1 }
  0x11   : > { %p1635_p4 = por %p1850_p1, %p60_p0  ;;  %p253_p7 = scmp.lt.s32.totalorder %s1536_s10, 3 }
  0x12   : > { %p1640_p6 = por %p246_p3, %p60_p0  ;;  %s1538_s16 = smov [#allocation10]  }
  0x13   : > { %p1645_p8 = pnand %p1067_p5, %p253_p7  ;;  %s265_s17 = sshll.u32 %s1538_s16, 4  ;;  %s266_s17 = int_to_ptr.vmem [resolvable:$true] %s265_s17 }
  0x14   : > { %s1862_s14 = scalar_select %p1640_p6, 1, 0 }
  0x15   : > { %p1209_p9 = pneg %p1645_p8  ;;  %s1539_s19 = smov [#allocation11]  }
  0x16   : > { %1863 = sst [smem:[#allocation21_spill]] %s1862_s14  ;;  %s281_s20 = sshll.u32 %s1539_s19, 4  ;;  %s282_s20 = int_to_ptr.vmem [resolvable:$true] %s281_s20 }
  0x17   : > { %p1654_p11 = pnand %p1209_p9, %p1850_p1  ;;  %s1347_s21 = scalar_lea.vmem %s266_s17, 3072 }
  0x18   : > { %p1348_p13 = scmp.ne.s32.totalorder %s266_s17, %s1347_s21  ;;  %p1355_p5 = scmp.lt.s32.totalorder %s266_s17, %s266_s17 }
  0x19   : > { %p1338_p12 = pneg %p1654_p11  ;;  %p1356_p7 = scmp.lt.s32.totalorder %s1347_s21, %s1347_s21 }
  0x1b   : > { %p1350_p0 = pnand %p1348_p13, %p1338_p12  ;;  %p1357_p10 = por %p1356_p7, %p1355_p5 }
  0x1d   : > { %p1351_p3 = pneg %p1350_p0 }
  0x1f   : > { %p1358_p9 = pnand %p1357_p10, %p1351_p3 }
  0x21   : > { %1361 = shalt.err (!%p1358_p9)
}
  0x22   : > { %s1540_s22 = smov 192   ;;  %s1541_s23 = smov 12  }
  0x23   : > { %s1866_s2 = sld [smem:[#allocation25_spill]]  ;;  %s1373_s26 = scalar_lea.vmem %s282_s20, 1024 }
  0x24   : > { %p1374_p1 = scmp.ne.s32.totalorder %s282_s20, %s1373_s26  ;;  %p1381_p2 = scmp.lt.s32.totalorder %s282_s20, %s282_s20 }
  0x25   : > { %p1382_p6 = scmp.lt.s32.totalorder %s1373_s26, %s1373_s26 }
  0x26   : > { %p1376_p13 = pnand %p1374_p1, %p1338_p12 }
  0x27   : > { %p1383_p5 = por %p1382_p6, %p1381_p2 }
  0x28   : > { %p1377_p0 = pneg %p1376_p13 }
  0x29   : > { %1212 = dma.hbm_to_vmem [thread:$0]  (!%p1654_p11), %s1866_s2, 3072, %s266_s17, [#allocation9], %s1540_s22, %s1540_s22, %s1541_s23  }
  0x2a   : > { %p1384_p10 = pnand %p1383_p5, %p1377_p0 }
  0x2c   : > { %1387 = shalt.err (!%p1384_p10)
}
  0x2d   : > { %s1542_s12 = smov 64   ;;  %s1543_s16 = smov 4  }
  0x2e   : > { %s1867_s4 = sld [smem:[#allocation26_spill]]  ;;  %s40_s21 = sadd.s32 1, %s1532_s9 }
  0x2f   : > { %s47_s22 = sadd.s32 1, %s1524_s29  ;;  %p42_p1 = scmp.ge.s32.totalorder %s40_s21, 2 }
  0x30   : > { %p54_p2 = scmp.ne.s32.totalorder %s1524_s29, %s1520_s28  ;;  %p55_p6 = scmp.eq.s32.totalorder %s1536_s10, 0 }
  0x31   : > { %p1229_p12 = scmp.lt.s32.totalorder %s1536_s10, 2  ;;  %s1890_s21 = smov (%p42_p1, %s40_s21), 0 }
  0x32   : > { %1868 = sst [smem:[#allocation22_spill]] %s1890_s21  ;;  %p56_p3 = por %p55_p6, %p54_p2 }
  0x33   : > { %p1869_p7 = scmp.eq.s32.totalorder %s1626_s11, 1  ;;  %s44_s23 = ssub.s32 %s1532_s9, %s1890_s21 }
  0x34   : > { %1215 = dma.hbm_to_vmem [thread:$0]  (!%p1654_p11), %s1867_s4, 1024, %s282_s20, [#allocation12], %s1542_s12, %s1542_s12, %s1543_s16  }
  0x35   : > { %p1686_p9 = por %p1869_p7, %p54_p2  ;;  %s1693_s24 = sand.u32 1, %s1524_s29  }
  0x36   : > { %p45_p11 = scmp.eq.s32.totalorder %s44_s23, 0  ;;  %s1071_s20 = sshll.u32 %s1693_s24, 2 }
  0x37   : > { %s1072_s25 = sshll.u32 %s1532_s9, 6  ;;  %s1872_s0 = sld [smem:[#allocation24_spill]] }
  0x38   : > { %s1698_s26 = scalar_select %p45_p11, %s1524_s29, %s47_s22  }
  0x39   : > { %s308_s19 = scalar_lea.vmem [#allocation5], %s1071_s20  ;;  %p1705_p13 = pnand %p1229_p12, %p56_p3 }
  0x3a   : > { %1871 = sst [smem:[#allocation23_spill]] %s1698_s26  ;;  %s315_s2 = sshll.u32 %s308_s19, 4  ;;  %s316_s2 = int_to_ptr.vmem [resolvable:$true] %s315_s2 }
  0x3b   : > { %s322_s21 = sand.u32 1, %s1536_s10   ;;  %s305_s23 = scalar_lea.sflag [#allocation6], %s1693_s24 }
  0x3c   : > { %p1390_p0 = pneg %p1705_p13  ;;  %s1401_s22 = scalar_lea.vmem %s316_s2, 64 }
  0x3d   : > { %s313_s17 = scalar_lea.hbm %s1872_s0, %s1072_s25  ;;  %p1402_p5 = scmp.ne.s32.totalorder %s316_s2, %s1401_s22 }
  0x3e   : > { %s1544_s20 = smov [#allocation5]  }
  0x3f   : > { %p1404_p10 = pnand %p1402_p5, %p1390_p0  ;;  %s1406_s25 = sshll.u32 %s1544_s20, 4  ;;  %s1407_s25 = int_to_ptr.vmem [resolvable:$false] %s1406_s25 }
  0x40   : > { %s1408_s12 = scalar_lea.vmem %s1407_s25, 128  ;;  %p1409_p2 = scmp.lt.s32.totalorder %s316_s2, %s1407_s25 }
  0x41   : > { %p1405_p1 = pneg %p1404_p10  ;;  %p1410_p6 = scmp.lt.s32.totalorder %s1408_s12, %s1401_s22 }
  0x43   : > { %p1411_p12 = por %p1410_p6, %p1409_p2 }
  0x45   : > { %p1412_p3 = pnand %p1411_p12, %p1405_p1 }
  0x47   : > { %1415 = shalt.err (!%p1412_p3)
}
  0x48   : > { %1219 = dma.hbm_to_vmem [thread:$0]  (!%p1705_p13), %s313_s17, 64, %s316_s2, %s305_s23  }
  0x49   : > { %s1073_s16 = sshll.u32 %s1693_s24, 3  ;;  %s1074_s19 = sshll.u32 %s1532_s9, 7 }
  0x4a   : > { %s332_s29 = scalar_lea.hbm %s1842_s1, %s1074_s19  ;;  %s326_s20 = scalar_lea.vmem [#allocation8], %s1073_s16 }
  0x4b   : > { %s334_s10 = sshll.u32 %s326_s20, 4  ;;  %s323_s25 = scalar_lea.sflag [#allocation9], %s322_s21  ;;  %s335_s10 = int_to_ptr.vmem [resolvable:$true] %s334_s10 }
  0x4c   : > { %s1429_s22 = scalar_lea.vmem %s335_s10, 128  ;;  %s1545_s12 = smov [#allocation8]  }
  0x4d   : > { %p1430_p7 = scmp.ne.s32.totalorder %s335_s10, %s1429_s22  ;;  %s1434_s14 = sshll.u32 %s1545_s12, 4  ;;  %s1435_s14 = int_to_ptr.vmem [resolvable:$false] %s1434_s14 }
  0x4e   : > { %s1436_s2 = scalar_lea.vmem %s1435_s14, 256  ;;  %p1437_p10 = scmp.lt.s32.totalorder %s335_s10, %s1435_s14 }
  0x4f   : > { %p1432_p11 = pnand %p1430_p7, %p1390_p0  ;;  %p1438_p1 = scmp.lt.s32.totalorder %s1436_s2, %s1429_s22 }
  0x51   : > { %p1433_p5 = pneg %p1432_p11  ;;  %p1439_p2 = por %p1438_p1, %p1437_p10 }
  0x53   : > { %p1440_p6 = pnand %p1439_p2, %p1433_p5 }
  0x55   : > { %1443 = shalt.err (!%p1440_p6)
}
  0x56   : > { %1222 = dma.hbm_to_vmem [thread:$0]  (!%p1705_p13), %s332_s29, 128, %s335_s10, %s323_s25  }
  0x57   : > { %343 = sbr.rel (%p1645_p8) target bundleno = 1277 (0x4fd), region = 52  ;;  %s1731_s0 = sand.u32 (!%p1645_p8), 1, %s1520_s28  }
  0x58   : > { %s1076_s21 = sshll.u32 (!%p1645_p8), %s1731_s0, 2  ;;  %s346_s24 = scalar_lea.sflag (!%p1645_p8), [#allocation6], %s1731_s0 }
  0x59   : > { %s1735_s26 = scalar_lea.vmem (!%p1645_p8), [#allocation5], %s1076_s21 }
  0x5c   : > { %1495 = dma.done.wait (%p1635_p4), %s346_s24, 64  }
  0x5d   : > { %1497 = vsyncadd (%p1635_p4), %s346_s24, 4294967232  ;;  %s354_s4 = sand.u32 1, %s1626_s11   ;;  %s1077_s29 = sshll.u32 %s1731_s0, 3 }
  0x5e   : > { %s355_s10 = scalar_lea.sflag [#allocation9], %s354_s4  ;;  %s1745_s14 = scalar_lea.vmem [#allocation8], %s1077_s29 }
  0x5f   : > { %1499 = dma.done.wait (%p1635_p4), %s355_s10, 128  }
  0x60   : > { %1501 = vsyncadd (%p1635_p4), %s355_s10, 4294967168  ;;  %p1874_p8 = scmp.eq.s32.totalorder %s1626_s11, 0 }
  0x62   : > { %1503 = dma.done.wait (%p1874_p8), [#allocation9], 3072   ;;  %p1875_p13 = pmov %p1874_p8 }
  0x63   : > { %p1876_p0 = pmov %p1874_p8 }
  0x64   : > { %1505 = vsyncadd (%p1875_p13), [#allocation9], 4294964224 }
  0x65   : > { %1507 = dma.done.wait (%p1876_p0), [#allocation12], 1024   ;;  %p1877_p12 = pmov %p1876_p0 }
  0x66   : > { %v1546_v0 = vmov 0   ;;  %v1547_v1 = vmov 0.0   ;;  %v1290_v2 = vld [vmem:[#allocation10 + $0xac] ss:$12 sps:$4 sm:$0xff]   ;;  %v1292_v3 = vld [vmem:[#allocation10 + $0xa8] ss:$12 sps:$4 sm:$0xff]   ;;  %v444_v27 = vlaneseq }
  0x67   : > { %1509 = vsyncadd (%p1877_p12), [#allocation12], 4294966272  ;;  %619 = vmatprep.mubr.bf16.mxu0 %v1546_v0  ;;  %1143 = vmatprep.subr.bf16.mxu1 %v1547_v1  ;;  %v1293_v4 = vld [vmem:[#allocation10 + $0x94] ss:$12 sps:$4 sm:$0xff]   ;;  %v1295_v5 = vld [vmem:[#allocation10 + $0x90] ss:$12 sps:$4 sm:$0xff]  }
  0x68   : > { %587 = vmatprep.subr.bf16.mxu0 %v1290_v2  ;;  %v1296_v6 = vld [vmem:[#allocation10 + $0x7c] ss:$12 sps:$4 sm:$0xff]   ;;  %v1298_v7 = vld [vmem:[#allocation10 + $0x78] ss:$12 sps:$4 sm:$0xff]   ;;  %v1301_v9 = vld [vmem:[#allocation10 + $0x60] ss:$12 sps:$4 sm:$0xff]  }
  0x69   : > { %588 = vmatpush1.bf16.msra.mxu0 %v1292_v3  ;;  %v1299_v8 = vld [vmem:[#allocation10 + $0x64] ss:$12 sps:$4 sm:$0xff]   ;;  %v1302_v11 = vld [vmem:[#allocation10 + $0x4c] ss:$12 sps:$4 sm:$0xff]   ;;  %v1304_v13 = vld [vmem:[#allocation10 + $0x48] ss:$12 sps:$4 sm:$0xff]  }
  0x6a   : > { %589 = vmatprep.subr.bf16.mxu0 %v1293_v4  ;;  %v1314_v10 = vld [vmem:[#allocation10 + $0xb0] ss:$12 sps:$4 sm:$0xff]   ;;  %v1315_v12 = vld [vmem:[#allocation10 + $0x98] ss:$12 sps:$4 sm:$0xff]   ;;  %v1305_v14 = vld [vmem:[#allocation10 + $0x34] ss:$12 sps:$4 sm:$0xff]  }
  0x6b   : > { %1144 = vmatpush3.bf16.msra.mxu1 %v1314_v10  ;;  %v1307_v15 = vld [vmem:[#allocation10 + $0x30] ss:$12 sps:$4 sm:$0xff]   ;;  %v1316_v16 = vld [vmem:[#allocation10 + $0x80] ss:$12 sps:$4 sm:$0xff]   ;;  %v1317_v18 = vld [vmem:[#allocation10 + $0x68] ss:$12 sps:$4 sm:$0xff]  }
  0x6c   : > { %1145 = vmatprep.subr.bf16.mxu1 %v1547_v1  ;;  %v1308_v17 = vld [vmem:[#allocation10 + $0x1c] ss:$12 sps:$4 sm:$0xff]   ;;  %v1310_v19 = vld [vmem:[#allocation10 + $0x18] ss:$12 sps:$4 sm:$0xff]   ;;  %v1313_v22 = vld [vmem:[#allocation10] ss:$12 sps:$4 sm:$0xff]  }
  0x6d   : > { %590 = vmatpush1.bf16.msra.mxu0 %v1295_v5  ;;  %v1311_v20 = vld [vmem:[#allocation10 + $0x4] ss:$12 sps:$4 sm:$0xff]   ;;  %v409_v24 = vld [vmem:[%s1735_s26] sm:$0xf]  ;;  %vm1548_vm0 = vmmov 0   ;;  %v445_v28 = vshrl.u32 %v444_v27, 7 }
  0x6e   : > { %591 = vmatprep.subr.bf16.mxu0 %v1296_v6  ;;  %v1318_v21 = vld [vmem:[#allocation10 + $0x50] ss:$12 sps:$4 sm:$0xff]   ;;  %v1319_v23 = vld [vmem:[#allocation10 + $0x38] ss:$12 sps:$4 sm:$0xff]   ;;  %v1320_v25 = vld [vmem:[#allocation10 + $0x20] ss:$12 sps:$4 sm:$0xff]   ;;  %1159 = vmatprep.mubr.msk.bf16.mxu1 %vm1548_vm0, %v1547_v1 }
  0x6f   : > { %1146 = vmatpush3.bf16.msra.mxu1 %v1315_v12  ;;  %v1321_v26 = vld [vmem:[#allocation10 + $0x8] ss:$12 sps:$4 sm:$0xff]   ;;  %v446_v29 = vsub.s32 0, %v445_v28  ;;  %v442_v30 = vld [vmem:[%s1844_s3] sm:$0x7]  ;;  %v450_v31 = vsub.s32 1, %v445_v28 }
  0x70   : > { %1147 = vmatprep.subr.bf16.mxu1 %v1547_v1  ;;  %v454_v44 = vsub.s32 2, %v445_v28  ;;  %vm736_vm1 = vcmask 1043456   ;;  %vm721_vm2 = vcmask 64512   ;;  %v1322_v2 = vld [vmem:[#allocation11 + $0x38] sm:$0xff]   ;;  %v1323_v3 = vld [vmem:[#allocation11 + $0x30] sm:$0xff]   ;;  %v1324_v4 = vld [vmem:[#allocation11 + $0x28] sm:$0xff]  }
  0x71   : > { %592 = vmatpush1.bf16.msra.mxu0 %v1298_v7  ;;  %v447_v32 = vrot.slane %v442_v30, %v446_v29  ;;  %v451_v33 = vrot.slane %v442_v30, %v450_v31  ;;  %v1325_v5 = vld [vmem:[#allocation11 + $0x20] sm:$0xff]   ;;  %v1326_v6 = vld [vmem:[#allocation11 + $0x18] sm:$0xff]   ;;  %v1327_v7 = vld [vmem:[#allocation11 + $0x10] sm:$0xff]   ;;  %s1118_s25 = sshll.u32 %s1528_s30, 7  ;;  %s403_s22 = scalar_lea.vmem [#allocation13], %s1077_s29 }
  0x72   : > { %593 = vmatprep.subr.bf16.mxu0 %v1299_v8  ;;  %v455_v45 = vrot.slane %v442_v30, %v454_v44  ;;  %v1328_v8 = vld [vmem:[#allocation11 + $0x8] sm:$0xff]   ;;  %s941_s12 = sshll.u32 %s403_s22, 4  ;;  %s939_s24 = scalar_lea.hbm %s1849_s8, %s1118_s25  ;;  %s942_s12 = int_to_ptr.vmem [resolvable:$true] %s941_s12 }
  0x73   : > { %1148 = vmatpush3.bf16.msra.mxu1 %v1316_v16  ;;  %s927_s26 = scalar_lea.sflag [#allocation7], %s1731_s0  ;;  %s1444_s4 = scalar_lea.vmem %s942_s12, 128 }
  0x74   : > { %1149 = vmatprep.subr.bf16.mxu1 %v1547_v1  ;;  %p1445_p4 = scmp.ne.s32.totalorder %s942_s12, %s1444_s4  ;;  %s1549_s10 = smov [#allocation13]  }
  0x75   : > { %594 = vmatpush1.bf16.msra.mxu0 %v1301_v9  ;;  %v1329_v9 = vld [vmem:[#allocation11] sm:$0xff]  }
  0x76   : > { %595 = vmatprep.subr.bf16.mxu0 %v1302_v11  ;;  %p1446_p3 = pnand %p1445_p4, %p1686_p9 }
  0x77   : > { %1150 = vmatpush3.bf16.msra.mxu1 %v1317_v18  ;;  %v1106_v18 = vld [vmem:[%s1846_s5] ss:$0 sm:$0xff] }
  0x78   : > { %1151 = vmatprep.subr.bf16.mxu1 %v1547_v1  ;;  %p1447_p7 = pneg %p1446_p3 }
  0x79   : > { %596 = vmatpush1.bf16.msra.mxu0 %v1304_v13 }
  0x7a   : > { %597 = vmatprep.subr.bf16.mxu0 %v1305_v14 }
  0x7b   : > { %1152 = vmatpush3.bf16.msra.mxu1 %v1318_v21 }
  0x7c   : > { %1153 = vmatprep.subr.bf16.mxu1 %v1547_v1 }
  0x7d   : > { %598 = vmatpush1.bf16.msra.mxu0 %v1307_v15 }
  0x7e   : > { %599 = vmatprep.subr.bf16.mxu0 %v1308_v17 }
  0x7f   : > { %1154 = vmatpush3.bf16.msra.mxu1 %v1319_v23 }
  0x80   : > { %1155 = vmatprep.subr.bf16.mxu1 %v1547_v1 }
  0x81   : > { %600 = vmatpush1.bf16.msra.mxu0 %v1310_v19 }
  0x82   : > { %601 = vmatprep.subr.bf16.mxu0 %v1311_v20  ;;  %v894_v20 = vld [vmem:[%s1745_s14] sm:$0xff]  ;;  %s1448_s14 = sshll.u32 %s1549_s10, 4  ;;  %s1449_s14 = int_to_ptr.vmem [resolvable:$false] %s1448_s14 }
  0x83   : > { %1156 = vmatpush3.bf16.msra.mxu1 %v1320_v25  ;;  %s1450_s30 = scalar_lea.vmem %s1449_s14, 256  ;;  %p1451_p11 = scmp.lt.s32.totalorder %s942_s12, %s1449_s14 }
  0x84   : > { %1157 = vmatprep.subr.bf16.mxu1 %v1547_v1  ;;  %p1452_p5 = scmp.lt.s32.totalorder %s1450_s30, %s1444_s4 }
  0x85   : > { %602 = vmatpush1.bf16.msra.mxu0 %v1313_v22 }
  0x86   : > { %1175 = vmatprep.subr.bf16.mxu0 %v1547_v1  ;;  %p1453_p10 = por %p1452_p5, %p1451_p11 }
  0x87   : > { %1158 = vmatpush3.bf16.msra.mxu1 %v1321_v26 }
  0x88   : > { %620 = vmatmul.mubr.bf16.vlgmr.msra.gmra.mxu0 %v409_v24  ;;  %1163 = vmatprep.subr.bf16.mxu1 %v1547_v1  ;;  %p1454_p1 = pnand %p1453_p10, %p1447_p7 }
  0x89   : > { %1191 = vmatprep.mubr.msk.bf16.mxu0 %vm1548_vm0, %v1547_v1  ;;  %1176 = vmatpush3.bf16.msra.mxu0 %v1322_v2 }
  0x8a   : > { %1160 = vmatmul.mubr.bf16.vlgmr.msra.gmra.mxu1 %v409_v24  ;;  %1177 = vmatprep.subr.bf16.mxu0 %v1547_v1 }
  0x8b   : > { %1165 = vmatprep.mubr.msk.bf16.mxu1 %vm1548_vm0, %v1547_v1 }
  0x8d   : > { %1178 = vmatpush3.bf16.msra.mxu0 %v1323_v3 }
  0x8e   : > { %1179 = vmatprep.subr.bf16.mxu0 %v1547_v1 }
  0x91   : > { %1180 = vmatpush3.bf16.msra.mxu0 %v1324_v4 }
  0x92   : > { %1181 = vmatprep.subr.bf16.mxu0 %v1547_v1 }
  0x95   : > { %1182 = vmatpush3.bf16.msra.mxu0 %v1325_v5 }
  0x96   : > { %1183 = vmatprep.subr.bf16.mxu0 %v1547_v1 }
  0x99   : > { %1184 = vmatpush3.bf16.msra.mxu0 %v1326_v6 }
  0x9a   : > { %1185 = vmatprep.subr.bf16.mxu0 %v1547_v1 }
  0x9d   : > { %1186 = vmatpush3.bf16.msra.mxu0 %v1327_v7 }
  0x9e   : > { %1187 = vmatprep.subr.bf16.mxu0 %v1547_v1 }
  0xa1   : > { %1188 = vmatpush3.bf16.msra.mxu0 %v1328_v8 }
  0xa2   : > { %1189 = vmatprep.subr.bf16.mxu0 %v1547_v1 }
  0xa5   : > { %1190 = vmatpush3.bf16.msra.mxu0 %v1329_v9 }
 0x148   : > { %v621_v34 = vpop.f32.mrf.mxu0 }
 0x149   : > { %v622_v35 = vadd.f32 %v621_v34, %v447_v32 }
 0x14a   : > { %v623_v36 = vpop.f32.mrf.mxu0  ;;  %v662_v46 = vpop.f32.mrf.mxu1 }
 0x14b   : > { %v668_v37 = vpack.c.bf16 %v622_v35, %v622_v35  ;;  %v624_v38 = vadd.f32 %v623_v36, %v451_v33  ;;  %v663_v47 = vadd.f32 %v662_v46, %v455_v45  ;;  %v1115_v35 = vld [vmem:[%s1847_s6] ss:$0 sm:$0xff] }
 0x14c   : > { %v625_v39 = vpop.f32.mrf.mxu0  ;;  %v1161_v48 = vpop.f32.mrf.mxu1 }
 0x14d   : > { %669 = vst [vmem:[#allocation2] sm:$0xf] %v668_v37  ;;  %v670_v40 = vpack.c.bf16 %v624_v38, %v624_v38  ;;  %v672_v49 = vpack.c.bf16 %v663_v47, %v663_v47  ;;  %v1116_v37 = vld [vmem:[%s1848_s7] ss:$0 sm:$0xff] }
 0x14e   : > { %v626_v41 = vpop.f32.mrf.mxu0  ;;  %v665_v50 = vpop.f32.mrf.mxu1 }
 0x14f   : > { %671 = vst [vmem:[#allocation3] sm:$0xf] %v670_v40  ;;  %673 = vst [vmem:[#allocation4] sm:$0xf] %v672_v49 }
 0x150   : > { %v1162_v51 = vpop.f32.mrf.mxu1 }
 0x154   : > { %v679_v43 = vld [vmem:[#allocation2] sm:$0xf] }
 0x156   : > { %v680_v42 = vld [vmem:[#allocation3] sm:$0xf]  ;;  %v732_v52 = vld [vmem:[#allocation4] sm:$0xf] }
 0x157   : > { %1164 = vmatpush3.bf16.xpose.msra.mxu1 %v680_v42  ;;  %v738_v53 = vsel %vm736_vm1, %v732_v52, 0 }
 0x158   : > { %1169 = vmatprep.subr.bf16.mxu1 %v1547_v1 }
 0x15e   : > { %1166 = vmatmul.mubr.bf16.vlgmr.msra.gmra.mxu1 %v679_v43 }
 0x15f   : > { %1171 = vmatprep.mubr.msk.bf16.mxu1 %vm1548_vm0, %v1547_v1  ;;  %1170 = vmatpush3.bf16.msra.mxu1 %v738_v53 }
 0x21e   : > { %v715_v54 = vpop.f32.mrf.mxu1 }
 0x21f   : > { %v722_v55 = vsel %vm721_vm2, %v715_v54, -inf }
 0x220   : > { %723 = vmax.xlane.f32.xlu0 %v722_v55  ;;  %v1167_v56 = vpop.f32.mrf.mxu1 }
 0x222   : > { %v718_v57 = vpop.f32.mrf.mxu1 }
 0x224   : > { %v1168_v58 = vpop.f32.mrf.mxu1 }
 0x2a9   : > { %v724_v59 = vpop.xlane.xlu0 %723 }
 0x2aa   : > { %v725_v60 = vsub.f32 %v715_v54, %v724_v59 }
 0x2ac   : > { %v726_v61 = vmul.f32 1.442695, %v725_v60 }
 0x2ae   : > { %1330 = vpow2.f32 %v726_v61 }
 0x2bb   : > { %v1331_v62 = vpop.eup %1330 }
 0x2bc   : > { %v728_v63 = vsel %vm721_vm2, %v1331_v62, 0.0  ;;  %v731_v0 = vpack.c.bf16 %v1331_v62, %v1331_v62 }
 0x2bd   : > { %729 = vadd.xlane.f32.xlu0 %v728_v63 }
 0x2be   : > { %1172 = vmatmul.mubr.msk.bf16.vlgmr.msra.gmra.mxu1 %vm721_vm2, %v731_v0 }
 0x346   : > { %v730_v10 = vpop.xlane.xlu0 %729 }
 0x347   : > { %1332 = vrcp.f32 %v730_v10 }
 0x354   : > { %v1333_v11 = vpop.eup %1332 }
 0x37e   : > { %v774_v12 = vpop.f32.mrf.mxu1 }
 0x37f   : > { %v781_v13 = vmul.f32 %v1333_v11, %v774_v12 }
 0x380   : > { %v1173_v14 = vpop.f32.mrf.mxu1 }
 0x381   : > { %v782_v15 = vpack.c.bf16 %v781_v13, %v781_v13 }
 0x382   : > { %v777_v16 = vpop.f32.mrf.mxu1 }
 0x383   : > { %1192 = vmatmul.mubr.bf16.vlgmr.msra.gmra.mxu0 %v782_v15 }
 0x384   : > { %v1174_v17 = vpop.f32.mrf.mxu1 }
 0x443   : > { %v888_v19 = vpop.f32.mrf.mxu0 }
 0x444   : > { %v889_v21 = vadd.f32 %v1106_v18, %v888_v19 }
 0x445   : > { %v1193_v1 = vpop.f32.mrf.mxu0 }
 0x446   : > { %v895_v22 = vadd.f32 %v894_v20, %v889_v21 }
 0x447   : > { %v891_v23 = vpop.f32.mrf.mxu0 }
 0x448   : > { %896 = vadd.xlane.f32.xlu1 %v895_v22  ;;  %v899_v25 = vmul.f32 %v895_v22, %v895_v22 }
 0x449   : > { %v1194_v24 = vpop.f32.mrf.mxu0 }
 0x44c   : > { %900 = vadd.xlane.f32.xlu1 %v899_v25 }
 0x4d1   : > { %v897_v26 = vpop.xlane.xlu1 %896 }
 0x4d2   : > { %v898_v27 = vmul.f32 0.03125, %v897_v26 }
 0x4d4   : > { %v903_v29 = vmul.f32 %v898_v27, %v898_v27  ;;  %v905_v33 = vsub.f32 %v895_v22, %v898_v27 }
 0x4d5   : > { %v901_v28 = vpop.xlane.xlu1 %900 }
 0x4d6   : > { %v902_v30 = vmul.f32 0.03125, %v901_v28 }
 0x4d8   : > { %v904_v31 = vsub.f32 %v902_v30, %v903_v29 }
 0x4da   : > { %v906_v32 = vadd.f32 1e-05, %v904_v31 }
 0x4dc   : > { %1334 = vrsqrt.f32 %v906_v32 }
 0x4e9   : > { %v1335_v34 = vpop.eup %1334 }
 0x4ea   : > { %v908_v36 = vmul.f32 %v1335_v34, %v905_v33 }
 0x4ec   : > { %v916_v38 = vmul.f32 %v1115_v35, %v908_v36 }
 0x4ee   : > { %v924_v39 = vadd.f32 %v1116_v37, %v916_v38 }
 0x4f0   : > { %925 = vst [vmem:[%s403_s22] sm:$0xff] %v924_v39 }
 0x4f1   : > { %1457 = shalt.err (!%p1454_p1)
}
 0x4f2   : > { %s1458_s29 = scalar_lea.hbm %s939_s24, 128  ;;  %s1462_s13 = scalar_lea.hbm %s1849_s8, 256 }
 0x4f3   : > { %p1459_p2 = scmp.ne.s32.totalorder %s939_s24, %s1458_s29  ;;  %p1463_p13 = scmp.lt.s32.totalorder %s939_s24, %s1849_s8 }
 0x4f4   : > { %p1464_p0 = scmp.lt.s32.totalorder %s1462_s13, %s1458_s29 }
 0x4f5   : > { %p1460_p6 = pnand %p1459_p2, %p1686_p9 }
 0x4f6   : > { %p1465_p12 = por %p1464_p0, %p1463_p13 }
 0x4f7   : > { %p1461_p8 = pneg %p1460_p6 }
 0x4f9   : > { %p1466_p4 = pnand %p1465_p12, %p1461_p8 }
 0x4fb   : > { %1469 = shalt.err (!%p1466_p4)
}
 0x4fc   : > { %1207 = dma.vmem_to_hbm [thread:$0]  (%p1686_p9), %s942_s12, 128, %s939_s24, %s927_s26  }
 0x4fd PF: > { %s1878_s23 = sld [smem:[#allocation21_spill]]  ;;  %s953_s19 = sand.u32 1, %s1516_s27  }
 0x4fe   : > { %s1879_s16 = sld [smem:[#allocation20_spill]]  ;;  %s954_s20 = scalar_lea.sflag [#allocation7], %s953_s19 }
 0x503   : > { %p1880_p3 = scmp.ne.s32.totalorder %s1878_s23, 0 }
 0x504   : > { %p1881_p7 = scmp.ge.s32.totalorder %s1879_s16, 2 }
 0x506   : > { %p1224_p11 = pnand %p1881_p7, %p1880_p3 }
 0x508   : > { %p1225_p5 = pneg %p1224_p11 }
 0x50a   : > { %1511 = dma.done.wait (%p1225_p5), %s954_s20, 128  }
 0x50b   : > { %1513 = vsyncadd (%p1225_p5), %s954_s20, 4294967168  ;;  %s28_s10 = sadd.s32 1, %s1879_s16   ;;  %s1882_s25 = sld [smem:[#allocation19_spill]] }
 0x50c   : > { %p25_p10 = scmp.ge.s32.totalorder %s28_s10, 4   ;;  %s1883_s29 = sld [smem:[#allocation23_spill]] }
 0x50d   : > { %s1884_s18 = sld [smem:[#allocation22_spill]]  ;;  %s1885_s27 = smov %s1520_s28 }
 0x50e   : > { %s1887_s30 = smov %s1532_s9 }
 0x50f   :  { %27 = sbr.rel (!%p25_p10) target bundleno = 13 (0xd), region = 123 }
 0x511   : > { %s1886_s28 = smov %s1882_s25 }
 0x513   : > { %s1888_s9 = smov %s1884_s18 }
 0x514   :  { %959 = vsyncpa [#allocation6], 1 }
 0x515   :  { %961 = vsyncpa [#allocation6 + $0x1], 1 }
 0x516   :  { %962 = vsyncpa [#allocation9], 1 }
 0x517   :  { %964 = vsyncpa [#allocation9 + $0x1], 1 }
 0x518   :  { %965 = vsyncpa [#allocation12], 1 }
 0x519   :  { %966 = vsyncpa [#allocation7], 1 }
 0x51a   :  { %968 = vsyncpa [#allocation7 + $0x1], 1 }

// kernel: tpu_custom_call.1
= control target key start
LH: loop header
LB: loop body
LE: loop exit
PB: predicated region body
PF: predicated region fallthrough
CT: control target
= control target key end

     0   :  { %s1841_s0 = inlined_call_operand.hbm [shape: bf16[2,8,128], index: 0, kind: input, shape index: {}]   ;;  %s1842_s1 = inlined_call_operand.hbm [shape: f32[2,8,128], index: 1, kind: input, shape index: {}]   ;;  %s1843_s2 = inlined_call_operand.hbm [shape: bf16[128,384], index: 2, kind: input, shape index: {}]   ;;  %s1844_s3 = inlined_call_operand.vmem [shape: f32[1,384], index: 3, kind: input, shape index: {}]   ;;  %s1845_s4 = inlined_call_operand.hbm [shape: bf16[128,128], index: 4, kind: input, shape index: {}]   ;;  %s1846_s5 = inlined_call_operand.vmem [shape: f32[1,128], index: 5, kind: input, shape index: {}]   ;;  %s1847_s6 = inlined_call_operand.vmem [shape: f32[1,128], index: 6, kind: input, shape index: {}]   ;;  %s1848_s7 = inlined_call_operand.vmem [shape: f32[1,128], index: 7, kind: input, shape index: {}]   ;;  %s1849_s8 = inlined_call_operand.hbm [shape: f32[2,8,128], index: 8, kind: output, shape index: {}]  }
   0x1   :  { %1856 = sst [smem:[#allocation24_spill]] %s1841_s0 }
   0x2   :  { %1857 = sst [smem:[#allocation25_spill]] %s1843_s2 }
   0x3   :  { %1858 = sst [smem:[#allocation26_spill]] %s1845_s4 }
   0x4   :  { %13 = vsyncpa [#allocation6], 0 }
   0x5   :  { %15 = vsyncpa [#allocation6 + $0x1], 0 }
   0x6   :  { %16 = vsyncpa [#allocation9], 0 }
   0x7   :  { %18 = vsyncpa [#allocation9 + $0x1], 0 }
   0x8   :  { %19 = vsyncpa [#allocation12], 0 }
   0x9   :  { %20 = vsyncpa [#allocation7], 0 }
   0xa   :  { %22 = vsyncpa [#allocation7 + $0x1], 0  ;;  %s1595_s27 = smov 0   ;;  %s1597_s28 = smov 0  }
   0xb   :  { %s1599_s29 = smov 0   ;;  %s1601_s30 = smov 0  }
   0xc   :  { %s1603_s9 = smov 0   ;;  %s1605_s10 = smov 0  }
   0xd LB: > { %1859 = sst [smem:[#allocation19_spill]] %s1524_s29  ;;  %s1626_s11 = sadd.s32 4294967295, %s1536_s10   ;;  %s1536_s10 = sphi %s1605_s10, %s28_s10   ;;  %s1532_s9 = sphi %s1603_s9, %s1888_s9   ;;  %s1528_s30 = sphi %s1601_s30, %s1887_s30   ;;  %s1524_s29 = sphi %s1599_s29, %s1883_s29   ;;  %s1520_s28 = sphi %s1597_s28, %s1886_s28   ;;  %s1516_s27 = sphi %s1595_s27, %s1885_s27  }
   0xe   : > { %1860 = sst [smem:[#allocation20_spill]] %s1536_s10  ;;  %s1066_s12 = sadd.s32 4294967294, %s1536_s10  }
   0xf   : > { %p60_p0 = scmp.ne.s32.totalorder %s1520_s28, %s1516_s27  ;;  %p1850_p1 = scmp.eq.s32.totalorder %s1626_s11, 0 }
  0x10   : > { %p246_p3 = scmp.eq.s32.totalorder %s1066_s12, 1  ;;  %p1067_p5 = scmp.ge.s32.totalorder %s1536_s10, 1 }
  0x11   : > { %p1635_p4 = por %p1850_p1, %p60_p0  ;;  %p253_p7 = scmp.lt.s32.totalorder %s1536_s10, 3 }
  0x12   : > { %p1640_p6 = por %p246_p3, %p60_p0  ;;  %s1538_s16 = smov [#allocation10]  }
  0x13   : > { %p1645_p8 = pnand %p1067_p5, %p253_p7  ;;  %s265_s17 = sshll.u32 %s1538_s16, 4  ;;  %s266_s17 = int_to_ptr.vmem [resolvable:$true] %s265_s17 }
  0x14   : > { %s1862_s14 = scalar_select %p1640_p6, 1, 0 }
  0x15   : > { %p1209_p9 = pneg %p1645_p8  ;;  %s1539_s19 = smov [#allocation11]  }
  0x16   : > { %1863 = sst [smem:[#allocation21_spill]] %s1862_s14  ;;  %s281_s20 = sshll.u32 %s1539_s19, 4  ;;  %s282_s20 = int_to_ptr.vmem [resolvable:$true] %s281_s20 }
  0x17   : > { %p1654_p11 = pnand %p1209_p9, %p1850_p1  ;;  %s1347_s21 = scalar_lea.vmem %s266_s17, 3072 }
  0x18   : > { %p1348_p13 = scmp.ne.s32.totalorder %s266_s17, %s1347_s21  ;;  %p1355_p5 = scmp.lt.s32.totalorder %s266_s17, %s266_s17 }
  0x19   : > { %p1338_p12 = pneg %p1654_p11  ;;  %p1356_p7 = scmp.lt.s32.totalorder %s1347_s21, %s1347_s21 }
  0x1b   : > { %p1350_p0 = pnand %p1348_p13, %p1338_p12  ;;  %p1357_p10 = por %p1356_p7, %p1355_p5 }
  0x1d   : > { %p1351_p3 = pneg %p1350_p0 }
  0x1f   : > { %p1358_p9 = pnand %p1357_p10, %p1351_p3 }
  0x21   : > { %1361 = shalt.err (!%p1358_p9)
}
  0x22   : > { %s1540_s22 = smov 192   ;;  %s1541_s23 = smov 12  }
  0x23   : > { %s1866_s2 = sld [smem:[#allocation25_spill]]  ;;  %s1373_s26 = scalar_lea.vmem %s282_s20, 1024 }
  0x24   : > { %p1374_p1 = scmp.ne.s32.totalorder %s282_s20, %s1373_s26  ;;  %p1381_p2 = scmp.lt.s32.totalorder %s282_s20, %s282_s20 }
  0x25   : > { %p1382_p6 = scmp.lt.s32.totalorder %s1373_s26, %s1373_s26 }
  0x26   : > { %p1376_p13 = pnand %p1374_p1, %p1338_p12 }
  0x27   : > { %p1383_p5 = por %p1382_p6, %p1381_p2 }
  0x28   : > { %p1377_p0 = pneg %p1376_p13 }
  0x29   : > { %1212 = dma.hbm_to_vmem [thread:$0]  (!%p1654_p11), %s1866_s2, 3072, %s266_s17, [#allocation9], %s1540_s22, %s1540_s22, %s1541_s23  }
  0x2a   : > { %p1384_p10 = pnand %p1383_p5, %p1377_p0 }
  0x2c   : > { %1387 = shalt.err (!%p1384_p10)
}
  0x2d   : > { %s1542_s12 = smov 64   ;;  %s1543_s16 = smov 4  }
  0x2e   : > { %s1867_s4 = sld [smem:[#allocation26_spill]]  ;;  %s40_s21 = sadd.s32 1, %s1532_s9 }
  0x2f   : > { %s47_s22 = sadd.s32 1, %s1524_s29  ;;  %p42_p1 = scmp.ge.s32.totalorder %s40_s21, 2 }
  0x30   : > { %p54_p2 = scmp.ne.s32.totalorder %s1524_s29, %s1520_s28  ;;  %p55_p6 = scmp.eq.s32.totalorder %s1536_s10, 0 }
  0x31   : > { %p1229_p12 = scmp.lt.s32.totalorder %s1536_s10, 2  ;;  %s1890_s21 = smov (%p42_p1, %s40_s21), 0 }
  0x32   : > { %1868 = sst [smem:[#allocation22_spill]] %s1890_s21  ;;  %p56_p3 = por %p55_p6, %p54_p2 }
  0x33   : > { %p1869_p7 = scmp.eq.s32.totalorder %s1626_s11, 1  ;;  %s44_s23 = ssub.s32 %s1532_s9, %s1890_s21 }
  0x34   : > { %1215 = dma.hbm_to_vmem [thread:$0]  (!%p1654_p11), %s1867_s4, 1024, %s282_s20, [#allocation12], %s1542_s12, %s1542_s12, %s1543_s16  }
  0x35   : > { %p1686_p9 = por %p1869_p7, %p54_p2  ;;  %s1693_s24 = sand.u32 1, %s1524_s29  }
  0x36   : > { %p45_p11 = scmp.eq.s32.totalorder %s44_s23, 0  ;;  %s1071_s20 = sshll.u32 %s1693_s24, 2 }
  0x37   : > { %s1072_s25 = sshll.u32 %s1532_s9, 6  ;;  %s1872_s0 = sld [smem:[#allocation24_spill]] }
  0x38   : > { %s1698_s26 = scalar_select %p45_p11, %s1524_s29, %s47_s22  }
  0x39   : > { %s308_s19 = scalar_lea.vmem [#allocation5], %s1071_s20  ;;  %p1705_p13 = pnand %p1229_p12, %p56_p3 }
  0x3a   : > { %1871 = sst [smem:[#allocation23_spill]] %s1698_s26  ;;  %s315_s2 = sshll.u32 %s308_s19, 4  ;;  %s316_s2 = int_to_ptr.vmem [resolvable:$true] %s315_s2 }
  0x3b   : > { %s322_s21 = sand.u32 1, %s1536_s10   ;;  %s305_s23 = scalar_lea.sflag [#allocation6], %s1693_s24 }
  0x3c   : > { %p1390_p0 = pneg %p1705_p13  ;;  %s1401_s22 = scalar_lea.vmem %s316_s2, 64 }
  0x3d   : > { %s313_s17 = scalar_lea.hbm %s1872_s0, %s1072_s25  ;;  %p1402_p5 = scmp.ne.s32.totalorder %s316_s2, %s1401_s22 }
  0x3e   : > { %s1544_s20 = smov [#allocation5]  }
  0x3f   : > { %p1404_p10 = pnand %p1402_p5, %p1390_p0  ;;  %s1406_s25 = sshll.u32 %s1544_s20, 4  ;;  %s1407_s25 = int_to_ptr.vmem [resolvable:$false] %s1406_s25 }
  0x40   : > { %s1408_s12 = scalar_lea.vmem %s1407_s25, 128  ;;  %p1409_p2 = scmp.lt.s32.totalorder %s316_s2, %s1407_s25 }
  0x41   : > { %p1405_p1 = pneg %p1404_p10  ;;  %p1410_p6 = scmp.lt.s32.totalorder %s1408_s12, %s1401_s22 }
  0x43   : > { %p1411_p12 = por %p1410_p6, %p1409_p2 }
  0x45   : > { %p1412_p3 = pnand %p1411_p12, %p1405_p1 }
  0x47   : > { %1415 = shalt.err (!%p1412_p3)
}
  0x48   : > { %1219 = dma.hbm_to_vmem [thread:$0]  (!%p1705_p13), %s313_s17, 64, %s316_s2, %s305_s23  }
  0x49   : > { %s1073_s16 = sshll.u32 %s1693_s24, 3  ;;  %s1074_s19 = sshll.u32 %s1532_s9, 7 }
  0x4a   : > { %s332_s29 = scalar_lea.hbm %s1842_s1, %s1074_s19  ;;  %s326_s20 = scalar_lea.vmem [#allocation8], %s1073_s16 }
  0x4b   : > { %s334_s10 = sshll.u32 %s326_s20, 4  ;;  %s323_s25 = scalar_lea.sflag [#allocation9], %s322_s21  ;;  %s335_s10 = int_to_ptr.vmem [resolvable:$true] %s334_s10 }
  0x4c   : > { %s1429_s22 = scalar_lea.vmem %s335_s10, 128  ;;  %s1545_s12 = smov [#allocation8]  }
  0x4d   : > { %p1430_p7 = scmp.ne.s32.totalorder %s335_s10, %s1429_s22  ;;  %s1434_s14 = sshll.u32 %s1545_s12, 4  ;;  %s1435_s14 = int_to_ptr.vmem [resolvable:$false] %s1434_s14 }
  0x4e   : > { %s1436_s2 = scalar_lea.vmem %s1435_s14, 256  ;;  %p1437_p10 = scmp.lt.s32.totalorder %s335_s10, %s1435_s14 }
  0x4f   : > { %p1432_p11 = pnand %p1430_p7, %p1390_p0  ;;  %p1438_p1 = scmp.lt.s32.totalorder %s1436_s2, %s1429_s22 }
  0x51   : > { %p1433_p5 = pneg %p1432_p11  ;;  %p1439_p2 = por %p1438_p1, %p1437_p10 }
  0x53   : > { %p1440_p6 = pnand %p1439_p2, %p1433_p5 }
  0x55   : > { %1443 = shalt.err (!%p1440_p6)
}
  0x56   : > { %1222 = dma.hbm_to_vmem [thread:$0]  (!%p1705_p13), %s332_s29, 128, %s335_s10, %s323_s25  }
  0x57   : > { %343 = sbr.rel (%p1645_p8) target bundleno = 1277 (0x4fd), region = 52  ;;  %s1731_s0 = sand.u32 (!%p1645_p8), 1, %s1520_s28  }
  0x58   : > { %s1076_s21 = sshll.u32 (!%p1645_p8), %s1731_s0, 2  ;;  %s346_s24 = scalar_lea.sflag (!%p1645_p8), [#allocation6], %s1731_s0 }
  0x59   : > { %s1735_s26 = scalar_lea.vmem (!%p1645_p8), [#allocation5], %s1076_s21 }
  0x5c   : > { %1495 = dma.done.wait (%p1635_p4), %s346_s24, 64  }
  0x5d   : > { %1497 = vsyncadd (%p1635_p4), %s346_s24, 4294967232  ;;  %s354_s4 = sand.u32 1, %s1626_s11   ;;  %s1077_s29 = sshll.u32 %s1731_s0, 3 }
  0x5e   : > { %s355_s10 = scalar_lea.sflag [#allocation9], %s354_s4  ;;  %s1745_s14 = scalar_lea.vmem [#allocation8], %s1077_s29 }
  0x5f   : > { %1499 = dma.done.wait (%p1635_p4), %s355_s10, 128  }
  0x60   : > { %1501 = vsyncadd (%p1635_p4), %s355_s10, 4294967168  ;;  %p1874_p8 = scmp.eq.s32.totalorder %s1626_s11, 0 }
  0x62   : > { %1503 = dma.done.wait (%p1874_p8), [#allocation9], 3072   ;;  %p1875_p13 = pmov %p1874_p8 }
  0x63   : > { %p1876_p0 = pmov %p1874_p8 }
  0x64   : > { %1505 = vsyncadd (%p1875_p13), [#allocation9], 4294964224 }
  0x65   : > { %1507 = dma.done.wait (%p1876_p0), [#allocation12], 1024   ;;  %p1877_p12 = pmov %p1876_p0 }
  0x66   : > { %v1546_v0 = vmov 0   ;;  %v1547_v1 = vmov 0.0   ;;  %v1290_v2 = vld [vmem:[#allocation10 + $0xac] ss:$12 sps:$4 sm:$0xff]   ;;  %v1292_v3 = vld [vmem:[#allocation10 + $0xa8] ss:$12 sps:$4 sm:$0xff]   ;;  %v444_v27 = vlaneseq }
  0x67   : > { %1509 = vsyncadd (%p1877_p12), [#allocation12], 4294966272  ;;  %619 = vmatprep.mubr.bf16.mxu0 %v1546_v0  ;;  %1143 = vmatprep.subr.bf16.mxu1 %v1547_v1  ;;  %v1293_v4 = vld [vmem:[#allocation10 + $0x94] ss:$12 sps:$4 sm:$0xff]   ;;  %v1295_v5 = vld [vmem:[#allocation10 + $0x90] ss:$12 sps:$4 sm:$0xff]  }
  0x68   : > { %587 = vmatprep.subr.bf16.mxu0 %v1290_v2  ;;  %v1296_v6 = vld [vmem:[#allocation10 + $0x7c] ss:$12 sps:$4 sm:$0xff]   ;;  %v1298_v7 = vld [vmem:[#allocation10 + $0x78] ss:$12 sps:$4 sm:$0xff]   ;;  %v1301_v9 = vld [vmem:[#allocation10 + $0x60] ss:$12 sps:$4 sm:$0xff]  }
  0x69   : > { %588 = vmatpush1.bf16.msra.mxu0 %v1292_v3  ;;  %v1299_v8 = vld [vmem:[#allocation10 + $0x64] ss:$12 sps:$4 sm:$0xff]   ;;  %v1302_v11 = vld [vmem:[#allocation10 + $0x4c] ss:$12 sps:$4 sm:$0xff]   ;;  %v1304_v13 = vld [vmem:[#allocation10 + $0x48] ss:$12 sps:$4 sm:$0xff]  }
  0x6a   : > { %589 = vmatprep.subr.bf16.mxu0 %v1293_v4  ;;  %v1314_v10 = vld [vmem:[#allocation10 + $0xb0] ss:$12 sps:$4 sm:$0xff]   ;;  %v1315_v12 = vld [vmem:[#allocation10 + $0x98] ss:$12 sps:$4 sm:$0xff]   ;;  %v1305_v14 = vld [vmem:[#allocation10 + $0x34] ss:$12 sps:$4 sm:$0xff]  }
  0x6b   : > { %1144 = vmatpush3.bf16.msra.mxu1 %v1314_v10  ;;  %v1307_v15 = vld [vmem:[#allocation10 + $0x30] ss:$12 sps:$4 sm:$0xff]   ;;  %v1316_v16 = vld [vmem:[#allocation10 + $0x80] ss:$12 sps:$4 sm:$0xff]   ;;  %v1317_v18 = vld [vmem:[#allocation10 + $0x68] ss:$12 sps:$4 sm:$0xff]  }
  0x6c   : > { %1145 = vmatprep.subr.bf16.mxu1 %v1547_v1  ;;  %v1308_v17 = vld [vmem:[#allocation10 + $0x1c] ss:$12 sps:$4 sm:$0xff]   ;;  %v1310_v19 = vld [vmem:[#allocation10 + $0x18] ss:$12 sps:$4 sm:$0xff]   ;;  %v1313_v22 = vld [vmem:[#allocation10] ss:$12 sps:$4 sm:$0xff]  }
  0x6d   : > { %590 = vmatpush1.bf16.msra.mxu0 %v1295_v5  ;;  %v1311_v20 = vld [vmem:[#allocation10 + $0x4] ss:$12 sps:$4 sm:$0xff]   ;;  %v409_v24 = vld [vmem:[%s1735_s26] sm:$0xf]  ;;  %vm1548_vm0 = vmmov 0   ;;  %v445_v28 = vshrl.u32 %v444_v27, 7 }
  0x6e   : > { %591 = vmatprep.subr.bf16.mxu0 %v1296_v6  ;;  %v1318_v21 = vld [vmem:[#allocation10 + $0x50] ss:$12 sps:$4 sm:$0xff]   ;;  %v1319_v23 = vld [vmem:[#allocation10 + $0x38] ss:$12 sps:$4 sm:$0xff]   ;;  %v1320_v25 = vld [vmem:[#allocation10 + $0x20] ss:$12 sps:$4 sm:$0xff]   ;;  %1159 = vmatprep.mubr.msk.bf16.mxu1 %vm1548_vm0, %v1547_v1 }
  0x6f   : > { %1146 = vmatpush3.bf16.msra.mxu1 %v1315_v12  ;;  %v1321_v26 = vld [vmem:[#allocation10 + $0x8] ss:$12 sps:$4 sm:$0xff]   ;;  %v446_v29 = vsub.s32 0, %v445_v28  ;;  %v442_v30 = vld [vmem:[%s1844_s3] sm:$0x7]  ;;  %v450_v31 = vsub.s32 1, %v445_v28 }
  0x70   : > { %1147 = vmatprep.subr.bf16.mxu1 %v1547_v1  ;;  %v454_v44 = vsub.s32 2, %v445_v28  ;;  %vm736_vm1 = vcmask 1043456   ;;  %vm721_vm2 = vcmask 64512   ;;  %v1322_v2 = vld [vmem:[#allocation11 + $0x38] sm:$0xff]   ;;  %v1323_v3 = vld [vmem:[#allocation11 + $0x30] sm:$0xff]   ;;  %v1324_v4 = vld [vmem:[#allocation11 + $0x28] sm:$0xff]  }
  0x71   : > { %592 = vmatpush1.bf16.msra.mxu0 %v1298_v7  ;;  %v447_v32 = vrot.slane %v442_v30, %v446_v29  ;;  %v451_v33 = vrot.slane %v442_v30, %v450_v31  ;;  %v1325_v5 = vld [vmem:[#allocation11 + $0x20] sm:$0xff]   ;;  %v1326_v6 = vld [vmem:[#allocation11 + $0x18] sm:$0xff]   ;;  %v1327_v7 = vld [vmem:[#allocation11 + $0x10] sm:$0xff]   ;;  %s1118_s25 = sshll.u32 %s1528_s30, 7  ;;  %s403_s22 = scalar_lea.vmem [#allocation13], %s1077_s29 }
  0x72   : > { %593 = vmatprep.subr.bf16.mxu0 %v1299_v8  ;;  %v455_v45 = vrot.slane %v442_v30, %v454_v44  ;;  %v1328_v8 = vld [vmem:[#allocation11 + $0x8] sm:$0xff]   ;;  %s941_s12 = sshll.u32 %s403_s22, 4  ;;  %s939_s24 = scalar_lea.hbm %s1849_s8, %s1118_s25  ;;  %s942_s12 = int_to_ptr.vmem [resolvable:$true] %s941_s12 }
  0x73   : > { %1148 = vmatpush3.bf16.msra.mxu1 %v1316_v16  ;;  %s927_s26 = scalar_lea.sflag [#allocation7], %s1731_s0  ;;  %s1444_s4 = scalar_lea.vmem %s942_s12, 128 }
  0x74   : > { %1149 = vmatprep.subr.bf16.mxu1 %v1547_v1  ;;  %p1445_p4 = scmp.ne.s32.totalorder %s942_s12, %s1444_s4  ;;  %s1549_s10 = smov [#allocation13]  }
  0x75   : > { %594 = vmatpush1.bf16.msra.mxu0 %v1301_v9  ;;  %v1329_v9 = vld [vmem:[#allocation11] sm:$0xff]  }
  0x76   : > { %595 = vmatprep.subr.bf16.mxu0 %v1302_v11  ;;  %p1446_p3 = pnand %p1445_p4, %p1686_p9 }
  0x77   : > { %1150 = vmatpush3.bf16.msra.mxu1 %v1317_v18  ;;  %v1106_v18 = vld [vmem:[%s1846_s5] ss:$0 sm:$0xff] }
  0x78   : > { %1151 = vmatprep.subr.bf16.mxu1 %v1547_v1  ;;  %p1447_p7 = pneg %p1446_p3 }
  0x79   : > { %596 = vmatpush1.bf16.msra.mxu0 %v1304_v13 }
  0x7a   : > { %597 = vmatprep.subr.bf16.mxu0 %v1305_v14 }
  0x7b   : > { %1152 = vmatpush3.bf16.msra.mxu1 %v1318_v21 }
  0x7c   : > { %1153 = vmatprep.subr.bf16.mxu1 %v1547_v1 }
  0x7d   : > { %598 = vmatpush1.bf16.msra.mxu0 %v1307_v15 }
  0x7e   : > { %599 = vmatprep.subr.bf16.mxu0 %v1308_v17 }
  0x7f   : > { %1154 = vmatpush3.bf16.msra.mxu1 %v1319_v23 }
  0x80   : > { %1155 = vmatprep.subr.bf16.mxu1 %v1547_v1 }
  0x81   : > { %600 = vmatpush1.bf16.msra.mxu0 %v1310_v19 }
  0x82   : > { %601 = vmatprep.subr.bf16.mxu0 %v1311_v20  ;;  %v894_v20 = vld [vmem:[%s1745_s14] sm:$0xff]  ;;  %s1448_s14 = sshll.u32 %s1549_s10, 4  ;;  %s1449_s14 = int_to_ptr.vmem [resolvable:$false] %s1448_s14 }
  0x83   : > { %1156 = vmatpush3.bf16.msra.mxu1 %v1320_v25  ;;  %s1450_s30 = scalar_lea.vmem %s1449_s14, 256  ;;  %p1451_p11 = scmp.lt.s32.totalorder %s942_s12, %s1449_s14 }
  0x84   : > { %1157 = vmatprep.subr.bf16.mxu1 %v1547_v1  ;;  %p1452_p5 = scmp.lt.s32.totalorder %s1450_s30, %s1444_s4 }
  0x85   : > { %602 = vmatpush1.bf16.msra.mxu0 %v1313_v22 }
  0x86   : > { %1175 = vmatprep.subr.bf16.mxu0 %v1547_v1  ;;  %p1453_p10 = por %p1452_p5, %p1451_p11 }
  0x87   : > { %1158 = vmatpush3.bf16.msra.mxu1 %v1321_v26 }
  0x88   : > { %620 = vmatmul.mubr.bf16.vlgmr.msra.gmra.mxu0 %v409_v24  ;;  %1163 = vmatprep.subr.bf16.mxu1 %v1547_v1  ;;  %p1454_p1 = pnand %p1453_p10, %p1447_p7 }
  0x89   : > { %1191 = vmatprep.mubr.msk.bf16.mxu0 %vm1548_vm0, %v1547_v1  ;;  %1176 = vmatpush3.bf16.msra.mxu0 %v1322_v2 }
  0x8a   : > { %1160 = vmatmul.mubr.bf16.vlgmr.msra.gmra.mxu1 %v409_v24  ;;  %1177 = vmatprep.subr.bf16.mxu0 %v1547_v1 }
  0x8b   : > { %1165 = vmatprep.mubr.msk.bf16.mxu1 %vm1548_vm0, %v1547_v1 }
  0x8d   : > { %1178 = vmatpush3.bf16.msra.mxu0 %v1323_v3 }
  0x8e   : > { %1179 = vmatprep.subr.bf16.mxu0 %v1547_v1 }
  0x91   : > { %1180 = vmatpush3.bf16.msra.mxu0 %v1324_v4 }
  0x92   : > { %1181 = vmatprep.subr.bf16.mxu0 %v1547_v1 }
  0x95   : > { %1182 = vmatpush3.bf16.msra.mxu0 %v1325_v5 }
  0x96   : > { %1183 = vmatprep.subr.bf16.mxu0 %v1547_v1 }
  0x99   : > { %1184 = vmatpush3.bf16.msra.mxu0 %v1326_v6 }
  0x9a   : > { %1185 = vmatprep.subr.bf16.mxu0 %v1547_v1 }
  0x9d   : > { %1186 = vmatpush3.bf16.msra.mxu0 %v1327_v7 }
  0x9e   : > { %1187 = vmatprep.subr.bf16.mxu0 %v1547_v1 }
  0xa1   : > { %1188 = vmatpush3.bf16.msra.mxu0 %v1328_v8 }
  0xa2   : > { %1189 = vmatprep.subr.bf16.mxu0 %v1547_v1 }
  0xa5   : > { %1190 = vmatpush3.bf16.msra.mxu0 %v1329_v9 }
 0x148   : > { %v621_v34 = vpop.f32.mrf.mxu0 }
 0x149   : > { %v622_v35 = vadd.f32 %v621_v34, %v447_v32 }
 0x14a   : > { %v623_v36 = vpop.f32.mrf.mxu0  ;;  %v662_v46 = vpop.f32.mrf.mxu1 }
 0x14b   : > { %v668_v37 = vpack.c.bf16 %v622_v35, %v622_v35  ;;  %v624_v38 = vadd.f32 %v623_v36, %v451_v33  ;;  %v663_v47 = vadd.f32 %v662_v46, %v455_v45  ;;  %v1115_v35 = vld [vmem:[%s1847_s6] ss:$0 sm:$0xff] }
 0x14c   : > { %v625_v39 = vpop.f32.mrf.mxu0  ;;  %v1161_v48 = vpop.f32.mrf.mxu1 }
 0x14d   : > { %669 = vst [vmem:[#allocation2] sm:$0xf] %v668_v37  ;;  %v670_v40 = vpack.c.bf16 %v624_v38, %v624_v38  ;;  %v672_v49 = vpack.c.bf16 %v663_v47, %v663_v47  ;;  %v1116_v37 = vld [vmem:[%s1848_s7] ss:$0 sm:$0xff] }
 0x14e   : > { %v626_v41 = vpop.f32.mrf.mxu0  ;;  %v665_v50 = vpop.f32.mrf.mxu1 }
 0x14f   : > { %671 = vst [vmem:[#allocation3] sm:$0xf] %v670_v40  ;;  %673 = vst [vmem:[#allocation4] sm:$0xf] %v672_v49 }
 0x150   : > { %v1162_v51 = vpop.f32.mrf.mxu1 }
 0x154   : > { %v679_v43 = vld [vmem:[#allocation2] sm:$0xf] }
 0x156   : > { %v680_v42 = vld [vmem:[#allocation3] sm:$0xf]  ;;  %v732_v52 = vld [vmem:[#allocation4] sm:$0xf] }
 0x157   : > { %1164 = vmatpush3.bf16.xpose.msra.mxu1 %v680_v42  ;;  %v738_v53 = vsel %vm736_vm1, %v732_v52, 0 }
 0x158   : > { %1169 = vmatprep.subr.bf16.mxu1 %v1547_v1 }
 0x15e   : > { %1166 = vmatmul.mubr.bf16.vlgmr.msra.gmra.mxu1 %v679_v43 }
 0x15f   : > { %1171 = vmatprep.mubr.msk.bf16.mxu1 %vm1548_vm0, %v1547_v1  ;;  %1170 = vmatpush3.bf16.msra.mxu1 %v738_v53 }
 0x21e   : > { %v715_v54 = vpop.f32.mrf.mxu1 }
 0x21f   : > { %v722_v55 = vsel %vm721_vm2, %v715_v54, -inf }
 0x220   : > { %723 = vmax.xlane.f32.xlu0 %v722_v55  ;;  %v1167_v56 = vpop.f32.mrf.mxu1 }
 0x222   : > { %v718_v57 = vpop.f32.mrf.mxu1 }
 0x224   : > { %v1168_v58 = vpop.f32.mrf.mxu1 }
 0x2a9   : > { %v724_v59 = vpop.xlane.xlu0 %723 }
 0x2aa   : > { %v725_v60 = vsub.f32 %v715_v54, %v724_v59 }
 0x2ac   : > { %v726_v61 = vmul.f32 1.442695, %v725_v60 }
 0x2ae   : > { %1330 = vpow2.f32 %v726_v61 }
 0x2bb   : > { %v1331_v62 = vpop.eup %1330 }
 0x2bc   : > { %v728_v63 = vsel %vm721_vm2, %v1331_v62, 0.0  ;;  %v731_v0 = vpack.c.bf16 %v1331_v62, %v1331_v62 }
 0x2bd   : > { %729 = vadd.xlane.f32.xlu0 %v728_v63 }
 0x2be   : > { %1172 = vmatmul.mubr.msk.bf16.vlgmr.msra.gmra.mxu1 %vm721_vm2, %v731_v0 }
 0x346   : > { %v730_v10 = vpop.xlane.xlu0 %729 }
 0x347   : > { %1332 = vrcp.f32 %v730_v10 }
 0x354   : > { %v1333_v11 = vpop.eup %1332 }
 0x37e   : > { %v774_v12 = vpop.f32.mrf.mxu1 }
 0x37f   : > { %v781_v13 = vmul.f32 %v1333_v11, %v774_v12 }
 0x380   : > { %v1173_v14 = vpop.f32.mrf.mxu1 }
 0x381   : > { %v782_v15 = vpack.c.bf16 %v781_v13, %v781_v13 }
 0x382   : > { %v777_v16 = vpop.f32.mrf.mxu1 }
 0x383   : > { %1192 = vmatmul.mubr.bf16.vlgmr.msra.gmra.mxu0 %v782_v15 }
 0x384   : > { %v1174_v17 = vpop.f32.mrf.mxu1 }
 0x443   : > { %v888_v19 = vpop.f32.mrf.mxu0 }
 0x444   : > { %v889_v21 = vadd.f32 %v1106_v18, %v888_v19 }
 0x445   : > { %v1193_v1 = vpop.f32.mrf.mxu0 }
 0x446   : > { %v895_v22 = vadd.f32 %v894_v20, %v889_v21 }
 0x447   : > { %v891_v23 = vpop.f32.mrf.mxu0 }
 0x448   : > { %896 = vadd.xlane.f32.xlu1 %v895_v22  ;;  %v899_v25 = vmul.f32 %v895_v22, %v895_v22 }
 0x449   : > { %v1194_v24 = vpop.f32.mrf.mxu0 }
 0x44c   : > { %900 = vadd.xlane.f32.xlu1 %v899_v25 }
 0x4d1   : > { %v897_v26 = vpop.xlane.xlu1 %896 }
 0x4d2   : > { %v898_v27 = vmul.f32 0.03125, %v897_v26 }
 0x4d4   : > { %v903_v29 = vmul.f32 %v898_v27, %v898_v27  ;;  %v905_v33 = vsub.f32 %v895_v22, %v898_v27 }
 0x4d5   : > { %v901_v28 = vpop.xlane.xlu1 %900 }
 0x4d6   : > { %v902_v30 = vmul.f32 0.03125, %v901_v28 }
 0x4d8   : > { %v904_v31 = vsub.f32 %v902_v30, %v903_v29 }
 0x4da   : > { %v906_v32 = vadd.f32 1e-05, %v904_v31 }
 0x4dc   : > { %1334 = vrsqrt.f32 %v906_v32 }
 0x4e9   : > { %v1335_v34 = vpop.eup %1334 }
 0x4ea   : > { %v908_v36 = vmul.f32 %v1335_v34, %v905_v33 }
 0x4ec   : > { %v916_v38 = vmul.f32 %v1115_v35, %v908_v36 }
 0x4ee   : > { %v924_v39 = vadd.f32 %v1116_v37, %v916_v38 }
 0x4f0   : > { %925 = vst [vmem:[%s403_s22] sm:$0xff] %v924_v39 }
 0x4f1   : > { %1457 = shalt.err (!%p1454_p1)
}
 0x4f2   : > { %s1458_s29 = scalar_lea.hbm %s939_s24, 128  ;;  %s1462_s13 = scalar_lea.hbm %s1849_s8, 256 }
 0x4f3   : > { %p1459_p2 = scmp.ne.s32.totalorder %s939_s24, %s1458_s29  ;;  %p1463_p13 = scmp.lt.s32.totalorder %s939_s24, %s1849_s8 }
 0x4f4   : > { %p1464_p0 = scmp.lt.s32.totalorder %s1462_s13, %s1458_s29 }
 0x4f5   : > { %p1460_p6 = pnand %p1459_p2, %p1686_p9 }
 0x4f6   : > { %p1465_p12 = por %p1464_p0, %p1463_p13 }
 0x4f7   : > { %p1461_p8 = pneg %p1460_p6 }
 0x4f9   : > { %p1466_p4 = pnand %p1465_p12, %p1461_p8 }
 0x4fb   : > { %1469 = shalt.err (!%p1466_p4)
}
 0x4fc   : > { %1207 = dma.vmem_to_hbm [thread:$0]  (%p1686_p9), %s942_s12, 128, %s939_s24, %s927_s26  }
 0x4fd PF: > { %s1878_s23 = sld [smem:[#allocation21_spill]]  ;;  %s953_s19 = sand.u32 1, %s1516_s27  }
 0x4fe   : > { %s1879_s16 = sld [smem:[#allocation20_spill]]  ;;  %s954_s20 = scalar_lea.sflag [#allocation7], %s953_s19 }
 0x503   : > { %p1880_p3 = scmp.ne.s32.totalorder %s1878_s23, 0 }
 0x504   : > { %p1881_p7 = scmp.ge.s32.totalorder %s1879_s16, 2 }
 0x506   : > { %p1224_p11 = pnand %p1881_p7, %p1880_p3 }
 0x508   : > { %p1225_p5 = pneg %p1224_p11 }
 0x50a   : > { %1511 = dma.done.wait (%p1225_p5), %s954_s20, 128  }
 0x50b   : > { %1513 = vsyncadd (%p1225_p5), %s954_s20, 4294967168  ;;  %s28_s10 = sadd.s32 1, %s1879_s16   ;;  %s1882_s25 = sld [smem:[#allocation19_spill]] }
 0x50c   : > { %p25_p10 = scmp.ge.s32.totalorder %s28_s10, 4   ;;  %s1883_s29 = sld [smem:[#allocation23_spill]] }
 0x50d   : > { %s1884_s18 = sld [smem:[#allocation22_spill]]  ;;  %s1885_s27 = smov %s1520_s28 }
 0x50e   : > { %s1887_s30 = smov %s1532_s9 }
 0x50f   :  { %27 = sbr.rel (!%p25_p10) target bundleno = 13 (0xd), region = 123 }
 0x511   : > { %s1886_s28 = smov %s1882_s25 }
 0x513   : > { %s1888_s9 = smov %s1884_s18 }
 0x514   :  { %959 = vsyncpa [#allocation6], 1 }
 0x515   :  { %961 = vsyncpa [#allocation6 + $0x1], 1 }
 0x516   :  { %962 = vsyncpa [#allocation9], 1 }
 0x517   :  { %964 = vsyncpa [#allocation9 + $0x1], 1 }
 0x518   :  { %965 = vsyncpa [#allocation12], 1 }
 0x519   :  { %966 = vsyncpa [#allocation7], 1 }
 0x51a   :  { %968 = vsyncpa [#allocation7 + $0x1], 1 }

</bundles_post_ra>
